<compile_context>
chip_gen: v7x
topology: tpu7x:2x2x1
jax: 0.10.0
libtpu: 0.0.40
codegen_flags: <defaults>
</compile_context>

<pallas_src>
import functools

import jax
import jax.numpy as jnp
from jax.experimental import pallas as pl
from jax.experimental.pallas import tpu as pltpu


def _total_loss_kernel(itest_ref, it_ref, mtv_ref, mtgt_ref, fr_ref,
                       wd_ref, bias_ref, out_ref,
                       acc_opt_ref, acc_vis_ref, acc_fus_ref,
                       acc_htv_ref, acc_wtv_ref, acc_g_ref,
                       *, B, C, H, W):
    b = pl.program_id(0)
    nb = pl.num_programs(0)

    @pl.when(b == 0)
    def _init():
        acc_opt_ref[...] = jnp.zeros_like(acc_opt_ref)
        acc_vis_ref[...] = jnp.zeros_like(acc_vis_ref)
        acc_fus_ref[...] = jnp.zeros_like(acc_fus_ref)
        acc_htv_ref[...] = jnp.zeros_like(acc_htv_ref)
        acc_wtv_ref[...] = jnp.zeros_like(acc_wtv_ref)
        acc_g_ref[...] = jnp.zeros_like(acc_g_ref)

    # ---- Loss_opt partials: lane-dense tiles, pure-VPU accumulate ----------
    d_opt = itest_ref[0].astype(jnp.float32) - it_ref[0].astype(jnp.float32)
    acc_opt_ref[...] += d_opt * d_opt

    # ---- Losses that need the (C, H, W) spatial view ------------------------
    mtv = mtv_ref[...].astype(jnp.float32)
    mtgt = mtgt_ref[...].astype(jnp.float32)
    fr = fr_ref[...].astype(jnp.float32)

    d_vis = mtv - mtgt
    acc_vis_ref[...] += jnp.sum(d_vis * d_vis, axis=0)        # (H, W)

    d_fus = fr - mtgt
    acc_fus_ref[...] += jnp.sum(d_fus * d_fus, axis=0)        # (H, W)

    # TV(FRVCCout), weight = 1
    # TODO(synk): pltpu.roll-based shifted differences would avoid the slice
    # relayout and ride the idle XLU slot; slices kept for lowering robustness.
    dh = fr[:, 1:, :] - fr[:, :H - 1, :]                      # (C, H-1, W)
    acc_htv_ref[...] += jnp.sum(dh * dh, axis=0)              # (H-1, W)
    dw = fr[:, :, 1:] - fr[:, :, :W - 1]                      # (C, H, W-1)
    acc_wtv_ref[...] += jnp.sum(dw * dw, axis=0)              # (H, W-1)

    # ---- Fused synthetic discriminator: logit_b = <fr, w> + bias ------------
    # N=1 "matmul" done as elementwise multiply + reduction (VPU/XLU), no MXU.
    prod = fr * wd_ref[...].astype(jnp.float32)
    s = jnp.sum(prod, axis=0)                                  # (H, W)
    s = jnp.sum(s, axis=0, keepdims=True)                      # (1, W)
    logit = jnp.sum(s, axis=1, keepdims=True) + bias_ref[0]    # (1, 1)
    # -log(sigmoid(x)) = softplus(-x)  (stable; no log(0) underflow)
    nls = jnp.maximum(-logit, 0.0) + jnp.log(1.0 + jnp.exp(-jnp.abs(logit)))
    acc_g_ref[...] += nls

    # ---- Epilogue: horizontal reductions + weighted total, last step only ---
    @pl.when(b == nb - 1)
    def _finalize():
        inv_n = 1.0 / float(B * C * H * W)
        loss_opt = jnp.sum(acc_opt_ref[...]) * inv_n
        loss_vis = jnp.sum(acc_vis_ref[...]) * inv_n
        loss_fus = jnp.sum(acc_fus_ref[...]) * inv_n
        h_tv = jnp.sum(acc_htv_ref[...])
        w_tv = jnp.sum(acc_wtv_ref[...])
        loss_tv = 2.0 * (h_tv * (1.0 / float(C * (H - 1) * W))
                         + w_tv * (1.0 / float(C * H * (W - 1)))) / float(B)
        loss_g = jnp.sum(acc_g_ref[...]) * (1.0 / float(B))
        total = (10.0 * loss_g + 10.0 * loss_fus + 5.0 * loss_tv
                 + 1.0 * loss_vis + 1.0 * loss_opt)
        out_ref[0] = loss_opt
        out_ref[1] = loss_vis
        out_ref[2] = loss_fus
        out_ref[3] = loss_tv
        out_ref[4] = loss_g
        out_ref[5] = total


def total_loss(Itest, It, Mtv, FRVCCout, Mtgt, disc_w, disc_b):
    """Returns (Loss_opt, Loss_vis, Loss_fus, Loss_tv, Loss_G, Loss) as f32 scalars."""
    B, C, H, W = Itest.shape
    CHW = C * H * W
    LANE = 128

    # Lane-dense views for the tensors that only feed a plain MSE.
    # Reshape is free (row-major contiguous); zero-padding (if CHW % 128 != 0)
    # cancels in the difference so the sums are unaffected.
    rp = pl.cdiv(CHW, LANE)
    pad = rp * LANE - CHW

    def lane_dense(a):
        flat = a.reshape(B, CHW)
        if pad:
            flat = jnp.pad(flat, ((0, 0), (0, pad)))
        return flat.reshape(B, rp, LANE)

    itest_ld = lane_dense(Itest)
    it_ld = lane_dense(It)

    spatial = lambda a: a.reshape(B * C, H, W)   # free reshape, native dtype
    mtv3, mtgt3, fr3 = spatial(Mtv), spatial(Mtgt), spatial(FRVCCout)
    wd3 = disc_w.reshape(C, H, W)

    kernel = functools.partial(_total_loss_kernel, B=B, C=C, H=H, W=W)

    per_batch = pl.BlockSpec((C, H, W), lambda b: (b, 0, 0))
    in_specs = [
        pl.BlockSpec((1, rp, LANE), lambda b: (b, 0, 0)),    # Itest (lane-dense)
        pl.BlockSpec((1, rp, LANE), lambda b: (b, 0, 0)),    # It    (lane-dense)
        per_batch,                                           # Mtv
        per_batch,                                           # Mtgt
        per_batch,                                           # FRVCCout (read once)
        pl.BlockSpec((C, H, W), lambda b: (0, 0, 0)),        # disc weight (resident)
        pl.BlockSpec(memory_space=pltpu.MemorySpace.SMEM),   # disc bias
    ]
    scratch_shapes = [
        pltpu.VMEM((rp, LANE), jnp.float32),   # opt partial sums
        pltpu.VMEM((H, W), jnp.float32),       # vis partial sums
        pltpu.VMEM((H, W), jnp.float32),       # fus partial sums
        pltpu.VMEM((H - 1, W), jnp.float32),   # h_tv partial sums
        pltpu.VMEM((H, W - 1), jnp.float32),   # w_tv partial sums
        pltpu.VMEM((1, 1), jnp.float32),       # sum_b -log(sigmoid(logit_b))
    ]

    out = pl.pallas_call(
        kernel,
        out_shape=jax.ShapeDtypeStruct((6,), jnp.float32),
        grid=(B,),
        in_specs=in_specs,
        out_specs=pl.BlockSpec(memory_space=pltpu.MemorySpace.SMEM),
        scratch_shapes=scratch_shapes,
        compiler_params=pltpu.CompilerParams(
            dimension_semantics=("arbitrary",)),
    )(itest_ld, it_ld, mtv3, mtgt3, fr3, wd3, disc_b.astype(jnp.float32))

    # TODO(synk): for large C*H*W add a second (channel) grid axis sized to the
    # per-generation VMEM budget, and on v7x split the batch axis across both
    # TensorCores (core_parallel) with a tiny partial-loss combine.
    return tuple(out[i] for i in range(6))


def _reference(Itest, It, Mtv, FRVCCout, Mtgt, disc_w, disc_b):
    mse = lambda a, b: jnp.mean((a - b) ** 2)
    B, C, H, W = FRVCCout.shape
    loss_opt = mse(Itest, It)
    loss_vis = mse(Mtv, Mtgt)
    loss_fus = mse(FRVCCout, Mtgt)
    h_tv = jnp.sum((FRVCCout[:, :, 1:, :] - FRVCCout[:, :, :-1, :]) ** 2)
    w_tv = jnp.sum((FRVCCout[:, :, :, 1:] - FRVCCout[:, :, :, :-1]) ** 2)
    loss_tv = 2.0 * (h_tv / (C * (H - 1) * W) + w_tv / (C * H * (W - 1))) / B
    d = jax.nn.sigmoid(FRVCCout.reshape(B, -1) @ disc_w + disc_b[0])
    loss_g = -jnp.mean(jnp.log(d))
    loss = 10 * loss_g + 10 * loss_fus + 5 * loss_tv + loss_vis + loss_opt
    return loss_opt, loss_vis, loss_fus, loss_tv, loss_g, loss


if __name__ == "__main__":
    B, C, H, W = 2, 4, 16, 16
    key = jax.random.PRNGKey(0)
    k1, k2, k3, k4, k5, k6 = jax.random.split(key, 6)

    Itest = jax.random.normal(k1, (B, C, H, W), jnp.float32)
    It = jax.random.normal(k2, (B, C, H, W), jnp.float32)
    Mtv = jax.random.normal(k3, (B, C, H, W), jnp.float32)
    FRVCCout = jax.random.normal(k4, (B, C, H, W), jnp.float32)
    Mtgt = jax.random.normal(k5, (B, C, H, W), jnp.float32)

    # Deterministic synthetic discriminator parameters.
    disc_w = 0.01 * jax.random.normal(k6, (C * H * W, 1), jnp.float32)
    disc_b = jnp.zeros((1,), jnp.float32)

    outs = total_loss(Itest, It, Mtv, FRVCCout, Mtgt, disc_w, disc_b)
    outs = jax.block_until_ready(outs)

    refs = _reference(Itest, It, Mtv, FRVCCout, Mtgt, disc_w, disc_b)
    for o, r in zip(outs, refs):
        assert jnp.allclose(o, r, rtol=2e-3, atol=2e-3), (o, r)

    print("KERNEL_OK")
</pallas_src>

<mosaic_0001>
module attributes {stable_mosaic.version = 11 : i64} {
  func.func @_total_loss_kernel(%arg0: i32, %arg1: memref<1x8x128xf32, #tpu.memory_space<vmem>>, %arg2: memref<1x8x128xf32, #tpu.memory_space<vmem>>, %arg3: memref<4x16x16xf32, #tpu.memory_space<vmem>>, %arg4: memref<4x16x16xf32, #tpu.memory_space<vmem>>, %arg5: memref<4x16x16xf32, #tpu.memory_space<vmem>>, %arg6: memref<4x16x16xf32, #tpu.memory_space<vmem>>, %arg7: memref<1xf32, #tpu.memory_space<smem>>, %arg8: memref<6xf32, #tpu.memory_space<smem>>, %arg9: memref<8x128xf32, #tpu.memory_space<vmem>>, %arg10: memref<16x16xf32, #tpu.memory_space<vmem>>, %arg11: memref<16x16xf32, #tpu.memory_space<vmem>>, %arg12: memref<15x16xf32, #tpu.memory_space<vmem>>, %arg13: memref<16x15xf32, #tpu.memory_space<vmem>>, %arg14: memref<1x1xf32, #tpu.memory_space<vmem>>) attributes {dimension_semantics = [#tpu.dimension_semantics<arbitrary>], iteration_bounds = array<i64: 2>, scalar_prefetch = 0 : i64, scratch_operands = 6 : i64, tpu.core_type = #tpu.core_type<tc>, window_params = [{transform_indices = @transform_0, window_bounds = array<i64: 1, 8, 128>}, {transform_indices = @transform_1, window_bounds = array<i64: 1, 8, 128>}, {transform_indices = @transform_2, window_bounds = array<i64: 4, 16, 16>}, {transform_indices = @transform_3, window_bounds = array<i64: 4, 16, 16>}, {transform_indices = @transform_4, window_bounds = array<i64: 4, 16, 16>}, {pipeline_mode = #tpu.pipeline_mode<synchronous>, transform_indices = @transform_5, window_bounds = array<i64: 4, 16, 16>}, {transform_indices = @transform_6, window_bounds = array<i64: 1>}, {transform_indices = @transform_7, window_bounds = array<i64: 6>}]} {
    %c0_i32 = arith.constant 0 : i32
    %0 = arith.cmpi eq, %arg0, %c0_i32 : i32
    %1 = arith.extui %0 : i1 to i32
    %c0_i32_0 = arith.constant 0 : i32
    %2 = arith.cmpi ne, %1, %c0_i32_0 : i32
    scf.if %2 {
      %cst_54 = arith.constant 0.000000e+00 : f32
      %71 = vector.broadcast %cst_54 : f32 to vector<8x128xf32>
      %c0_55 = arith.constant 0 : index
      %c0_56 = arith.constant 0 : index
      %72 = vector.load %arg9[%c0_55, %c0_56] : memref<8x128xf32, #tpu.memory_space<vmem>>, vector<8x128xf32>
      tpu.vector_store %arg9[%c0_55, %c0_56], %71 {strides = array<i32>} : memref<8x128xf32, #tpu.memory_space<vmem>>, vector<8x128xf32>,
      %cst_57 = arith.constant 0.000000e+00 : f32
      %73 = vector.broadcast %cst_57 : f32 to vector<16x16xf32>
      %c0_58 = arith.constant 0 : index
      %c0_59 = arith.constant 0 : index
      %74 = vector.load %arg10[%c0_58, %c0_59] : memref<16x16xf32, #tpu.memory_space<vmem>>, vector<16x16xf32>
      tpu.vector_store %arg10[%c0_58, %c0_59], %73 {strides = array<i32>} : memref<16x16xf32, #tpu.memory_space<vmem>>, vector<16x16xf32>,
      %cst_60 = arith.constant 0.000000e+00 : f32
      %75 = vector.broadcast %cst_60 : f32 to vector<16x16xf32>
      %c0_61 = arith.constant 0 : index
      %c0_62 = arith.constant 0 : index
      %76 = vector.load %arg11[%c0_61, %c0_62] : memref<16x16xf32, #tpu.memory_space<vmem>>, vector<16x16xf32>
      tpu.vector_store %arg11[%c0_61, %c0_62], %75 {strides = array<i32>} : memref<16x16xf32, #tpu.memory_space<vmem>>, vector<16x16xf32>,
      %cst_63 = arith.constant 0.000000e+00 : f32
      %77 = vector.broadcast %cst_63 : f32 to vector<15x16xf32>
      %c0_64 = arith.constant 0 : index
      %c0_65 = arith.constant 0 : index
      %78 = vector.load %arg12[%c0_64, %c0_65] : memref<15x16xf32, #tpu.memory_space<vmem>>, vector<15x16xf32>
      tpu.vector_store %arg12[%c0_64, %c0_65], %77 {strides = array<i32>} : memref<15x16xf32, #tpu.memory_space<vmem>>, vector<15x16xf32>,
      %cst_66 = arith.constant 0.000000e+00 : f32
      %79 = vector.broadcast %cst_66 : f32 to vector<16x15xf32>
      %c0_67 = arith.constant 0 : index
      %c0_68 = arith.constant 0 : index
      %80 = vector.load %arg13[%c0_67, %c0_68] : memref<16x15xf32, #tpu.memory_space<vmem>>, vector<16x15xf32>
      tpu.vector_store %arg13[%c0_67, %c0_68], %79 {strides = array<i32>} : memref<16x15xf32, #tpu.memory_space<vmem>>, vector<16x15xf32>,
      %cst_69 = arith.constant 0.000000e+00 : f32
      %81 = vector.broadcast %cst_69 : f32 to vector<1x1xf32>
      %c0_70 = arith.constant 0 : index
      %c0_71 = arith.constant 0 : index
      %82 = vector.load %arg14[%c0_70, %c0_71] : memref<1x1xf32, #tpu.memory_space<vmem>>, vector<1x1xf32>
      tpu.vector_store %arg14[%c0_70, %c0_71], %81 {strides = array<i32>} : memref<1x1xf32, #tpu.memory_space<vmem>>, vector<1x1xf32>,
    } else {
    }
    %c0 = arith.constant 0 : index
    %c0_1 = arith.constant 0 : index
    %c0_2 = arith.constant 0 : index
    %3 = vector.load %arg1[%c0, %c0_1, %c0_2] : memref<1x8x128xf32, #tpu.memory_space<vmem>>, vector<1x8x128xf32>
    %4 = vector.shape_cast %3 : vector<1x8x128xf32> to vector<8x128xf32>
    %c0_3 = arith.constant 0 : index
    %c0_4 = arith.constant 0 : index
    %c0_5 = arith.constant 0 : index
    %5 = vector.load %arg2[%c0_3, %c0_4, %c0_5] : memref<1x8x128xf32, #tpu.memory_space<vmem>>, vector<1x8x128xf32>
    %6 = vector.shape_cast %5 : vector<1x8x128xf32> to vector<8x128xf32>
    %7 = arith.subf %4, %6 : vector<8x128xf32>
    %c0_6 = arith.constant 0 : index
    %c0_7 = arith.constant 0 : index
    %8 = vector.load %arg9[%c0_6, %c0_7] : memref<8x128xf32, #tpu.memory_space<vmem>>, vector<8x128xf32>
    %9 = arith.mulf %7, %7 : vector<8x128xf32>
    %10 = arith.addf %8, %9 : vector<8x128xf32>
    %c0_8 = arith.constant 0 : index
    %c0_9 = arith.constant 0 : index
    %11 = vector.load %arg9[%c0_8, %c0_9] : memref<8x128xf32, #tpu.memory_space<vmem>>, vector<8x128xf32>
    tpu.vector_store %arg9[%c0_8, %c0_9], %10 {strides = array<i32>} : memref<8x128xf32, #tpu.memory_space<vmem>>, vector<8x128xf32>,
    %c0_10 = arith.constant 0 : index
    %c0_11 = arith.constant 0 : index
    %c0_12 = arith.constant 0 : index
    %12 = vector.load %arg3[%c0_10, %c0_11, %c0_12] : memref<4x16x16xf32, #tpu.memory_space<vmem>>, vector<4x16x16xf32>
    %c0_13 = arith.constant 0 : index
    %c0_14 = arith.constant 0 : index
    %c0_15 = arith.constant 0 : index
    %13 = vector.load %arg4[%c0_13, %c0_14, %c0_15] : memref<4x16x16xf32, #tpu.memory_space<vmem>>, vector<4x16x16xf32>
    %c0_16 = arith.constant 0 : index
    %c0_17 = arith.constant 0 : index
    %c0_18 = arith.constant 0 : index
    %14 = vector.load %arg5[%c0_16, %c0_17, %c0_18] : memref<4x16x16xf32, #tpu.memory_space<vmem>>, vector<4x16x16xf32>
    %15 = arith.subf %12, %13 : vector<4x16x16xf32>
    %c0_19 = arith.constant 0 : index
    %c0_20 = arith.constant 0 : index
    %16 = vector.load %arg10[%c0_19, %c0_20] : memref<16x16xf32, #tpu.memory_space<vmem>>, vector<16x16xf32>
    %17 = arith.mulf %15, %15 : vector<4x16x16xf32>
    %cst = arith.constant dense<0.000000e+00> : vector<16x16xf32>
    %18 = vector.multi_reduction <add>, %17, %cst [0] : vector<4x16x16xf32> to vector<16x16xf32>
    %19 = arith.addf %16, %18 : vector<16x16xf32>
    %c0_21 = arith.constant 0 : index
    %c0_22 = arith.constant 0 : index
    %20 = vector.load %arg10[%c0_21, %c0_22] : memref<16x16xf32, #tpu.memory_space<vmem>>, vector<16x16xf32>
    tpu.vector_store %arg10[%c0_21, %c0_22], %19 {strides = array<i32>} : memref<16x16xf32, #tpu.memory_space<vmem>>, vector<16x16xf32>,
    %21 = arith.subf %14, %13 : vector<4x16x16xf32>
    %c0_23 = arith.constant 0 : index
    %c0_24 = arith.constant 0 : index
    %22 = vector.load %arg11[%c0_23, %c0_24] : memref<16x16xf32, #tpu.memory_space<vmem>>, vector<16x16xf32>
    %23 = arith.mulf %21, %21 : vector<4x16x16xf32>
    %cst_25 = arith.constant dense<0.000000e+00> : vector<16x16xf32>
    %24 = vector.multi_reduction <add>, %23, %cst_25 [0] : vector<4x16x16xf32> to vector<16x16xf32>
    %25 = arith.addf %22, %24 : vector<16x16xf32>
    %c0_26 = arith.constant 0 : index
    %c0_27 = arith.constant 0 : index
    %26 = vector.load %arg11[%c0_26, %c0_27] : memref<16x16xf32, #tpu.memory_space<vmem>>, vector<16x16xf32>
    tpu.vector_store %arg11[%c0_26, %c0_27], %25 {strides = array<i32>} : memref<16x16xf32, #tpu.memory_space<vmem>>, vector<16x16xf32>,
    %27 = vector.extract_strided_slice %14 {offsets = [0, 1, 0], sizes = [4, 15, 16], strides = [1, 1, 1]} : vector<4x16x16xf32> to vector<4x15x16xf32>
    %28 = vector.extract_strided_slice %14 {offsets = [0, 0, 0], sizes = [4, 15, 16], strides = [1, 1, 1]} : vector<4x16x16xf32> to vector<4x15x16xf32>
    %29 = arith.subf %27, %28 : vector<4x15x16xf32>
    %c0_28 = arith.constant 0 : index
    %c0_29 = arith.constant 0 : index
    %30 = vector.load %arg12[%c0_28, %c0_29] : memref<15x16xf32, #tpu.memory_space<vmem>>, vector<15x16xf32>
    %31 = arith.mulf %29, %29 : vector<4x15x16xf32>
    %cst_30 = arith.constant dense<0.000000e+00> : vector<15x16xf32>
    %32 = vector.multi_reduction <add>, %31, %cst_30 [0] : vector<4x15x16xf32> to vector<15x16xf32>
    %33 = arith.addf %30, %32 : vector<15x16xf32>
    %c0_31 = arith.constant 0 : index
    %c0_32 = arith.constant 0 : index
    %34 = vector.load %arg12[%c0_31, %c0_32] : memref<15x16xf32, #tpu.memory_space<vmem>>, vector<15x16xf32>
    tpu.vector_store %arg12[%c0_31, %c0_32], %33 {strides = array<i32>} : memref<15x16xf32, #tpu.memory_space<vmem>>, vector<15x16xf32>,
    %35 = vector.extract_strided_slice %14 {offsets = [0, 0, 1], sizes = [4, 16, 15], strides = [1, 1, 1]} : vector<4x16x16xf32> to vector<4x16x15xf32>
    %36 = vector.extract_strided_slice %14 {offsets = [0, 0, 0], sizes = [4, 16, 15], strides = [1, 1, 1]} : vector<4x16x16xf32> to vector<4x16x15xf32>
    %37 = arith.subf %35, %36 : vector<4x16x15xf32>
    %c0_33 = arith.constant 0 : index
    %c0_34 = arith.constant 0 : index
    %38 = vector.load %arg13[%c0_33, %c0_34] : memref<16x15xf32, #tpu.memory_space<vmem>>, vector<16x15xf32>
    %39 = arith.mulf %37, %37 : vector<4x16x15xf32>
    %cst_35 = arith.constant dense<0.000000e+00> : vector<16x15xf32>
    %40 = vector.multi_reduction <add>, %39, %cst_35 [0] : vector<4x16x15xf32> to vector<16x15xf32>
    %41 = arith.addf %38, %40 : vector<16x15xf32>
    %c0_36 = arith.constant 0 : index
    %c0_37 = arith.constant 0 : index
    %42 = vector.load %arg13[%c0_36, %c0_37] : memref<16x15xf32, #tpu.memory_space<vmem>>, vector<16x15xf32>
    tpu.vector_store %arg13[%c0_36, %c0_37], %41 {strides = array<i32>} : memref<16x15xf32, #tpu.memory_space<vmem>>, vector<16x15xf32>,
    %c0_38 = arith.constant 0 : index
    %c0_39 = arith.constant 0 : index
    %c0_40 = arith.constant 0 : index
    %43 = vector.load %arg6[%c0_38, %c0_39, %c0_40] : memref<4x16x16xf32, #tpu.memory_space<vmem>>, vector<4x16x16xf32>
    %44 = arith.mulf %14, %43 : vector<4x16x16xf32>
    %cst_41 = arith.constant dense<0.000000e+00> : vector<16x16xf32>
    %45 = vector.multi_reduction <add>, %44, %cst_41 [0] : vector<4x16x16xf32> to vector<16x16xf32>
    %cst_42 = arith.constant dense<0.000000e+00> : vector<16xf32>
    %46 = vector.multi_reduction <add>, %45, %cst_42 [0] : vector<16x16xf32> to vector<16xf32>
    %47 = vector.shape_cast %46 : vector<16xf32> to vector<1x16xf32>
    %cst_43 = arith.constant dense<0.000000e+00> : vector<1xf32>
    %48 = vector.multi_reduction <add>, %47, %cst_43 [1] : vector<1x16xf32> to vector<1xf32>
    %49 = vector.shape_cast %48 : vector<1xf32> to vector<1x1xf32>
    %c0_44 = arith.constant 0 : index
    %50 = memref.load %arg7[%c0_44] : memref<1xf32, #tpu.memory_space<smem>>
    %51 = vector.broadcast %50 : f32 to vector<1x1xf32>
    %52 = arith.addf %49, %51 : vector<1x1xf32>
    %cst_45 = arith.constant 0.000000e+00 : f32
    %53 = vector.broadcast %cst_45 : f32 to vector<1x1xf32>
    %54 = arith.subf %53, %52 : vector<1x1xf32>
    %cst_46 = arith.constant 0.000000e+00 : f32
    %55 = vector.broadcast %cst_46 : f32 to vector<1x1xf32>
    %56 = arith.maximumf %54, %55 : vector<1x1xf32>
    %57 = math.absf %52 : vector<1x1xf32>
    %cst_47 = arith.constant 0.000000e+00 : f32
    %58 = vector.broadcast %cst_47 : f32 to vector<1x1xf32>
    %59 = arith.subf %58, %57 : vector<1x1xf32>
    %60 = math.exp %59 : vector<1x1xf32>
    %cst_48 = arith.constant 1.000000e+00 : f32
    %61 = vector.broadcast %cst_48 : f32 to vector<1x1xf32>
    %62 = arith.addf %61, %60 : vector<1x1xf32>
    %63 = math.log %62 : vector<1x1xf32>
    %64 = arith.addf %56, %63 : vector<1x1xf32>
    %c0_49 = arith.constant 0 : index
    %c0_50 = arith.constant 0 : index
    %65 = vector.load %arg14[%c0_49, %c0_50] : memref<1x1xf32, #tpu.memory_space<vmem>>, vector<1x1xf32>
    %66 = arith.addf %65, %64 : vector<1x1xf32>
    %c0_51 = arith.constant 0 : index
    %c0_52 = arith.constant 0 : index
    %67 = vector.load %arg14[%c0_51, %c0_52] : memref<1x1xf32, #tpu.memory_space<vmem>>, vector<1x1xf32>
    tpu.vector_store %arg14[%c0_51, %c0_52], %66 {strides = array<i32>} : memref<1x1xf32, #tpu.memory_space<vmem>>, vector<1x1xf32>,
    %c1_i32 = arith.constant 1 : i32
    %68 = arith.cmpi eq, %arg0, %c1_i32 : i32
    %69 = arith.extui %68 : i1 to i32
    %c0_i32_53 = arith.constant 0 : i32
    %70 = arith.cmpi ne, %69, %c0_i32_53 : i32
    scf.if %70 {
      %c0_54 = arith.constant 0 : index
      %c0_55 = arith.constant 0 : index
      %71 = vector.load %arg9[%c0_54, %c0_55] : memref<8x128xf32, #tpu.memory_space<vmem>>, vector<8x128xf32>
      %72 = vector.shape_cast %71 : vector<8x128xf32> to vector<1x8x128xf32>
      %cst_56 = arith.constant dense<0.000000e+00> : vector<1xf32>
      %73 = vector.multi_reduction <add>, %72, %cst_56 [1, 2] : vector<1x8x128xf32> to vector<1xf32>
      %74 = vector.shape_cast %73 : vector<1xf32> to vector<1x1x1xf32>
      %75 = vector.extract %74[0, 0, 0] : f32 from vector<1x1x1xf32>
      %cst_57 = arith.constant 4.8828125E-4 : f32
      %76 = arith.mulf %75, %cst_57 : f32
      %c0_58 = arith.constant 0 : index
      %c0_59 = arith.constant 0 : index
      %77 = vector.load %arg10[%c0_58, %c0_59] : memref<16x16xf32, #tpu.memory_space<vmem>>, vector<16x16xf32>
      %78 = vector.shape_cast %77 : vector<16x16xf32> to vector<1x16x16xf32>
      %cst_60 = arith.constant dense<0.000000e+00> : vector<1xf32>
      %79 = vector.multi_reduction <add>, %78, %cst_60 [1, 2] : vector<1x16x16xf32> to vector<1xf32>
      %80 = vector.shape_cast %79 : vector<1xf32> to vector<1x1x1xf32>
      %81 = vector.extract %80[0, 0, 0] : f32 from vector<1x1x1xf32>
      %cst_61 = arith.constant 4.8828125E-4 : f32
      %82 = arith.mulf %81, %cst_61 : f32
      %c0_62 = arith.constant 0 : index
      %c0_63 = arith.constant 0 : index
      %83 = vector.load %arg11[%c0_62, %c0_63] : memref<16x16xf32, #tpu.memory_space<vmem>>, vector<16x16xf32>
      %84 = vector.shape_cast %83 : vector<16x16xf32> to vector<1x16x16xf32>
      %cst_64 = arith.constant dense<0.000000e+00> : vector<1xf32>
      %85 = vector.multi_reduction <add>, %84, %cst_64 [1, 2] : vector<1x16x16xf32> to vector<1xf32>
      %86 = vector.shape_cast %85 : vector<1xf32> to vector<1x1x1xf32>
      %87 = vector.extract %86[0, 0, 0] : f32 from vector<1x1x1xf32>
      %cst_65 = arith.constant 4.8828125E-4 : f32
      %88 = arith.mulf %87, %cst_65 : f32
      %c0_66 = arith.constant 0 : index
      %c0_67 = arith.constant 0 : index
      %89 = vector.load %arg12[%c0_66, %c0_67] : memref<15x16xf32, #tpu.memory_space<vmem>>, vector<15x16xf32>
      %90 = vector.shape_cast %89 : vector<15x16xf32> to vector<1x15x16xf32>
      %cst_68 = arith.constant dense<0.000000e+00> : vector<1xf32>
      %91 = vector.multi_reduction <add>, %90, %cst_68 [1, 2] : vector<1x15x16xf32> to vector<1xf32>
      %92 = vector.shape_cast %91 : vector<1xf32> to vector<1x1x1xf32>
      %93 = vector.extract %92[0, 0, 0] : f32 from vector<1x1x1xf32>
      %c0_69 = arith.constant 0 : index
      %c0_70 = arith.constant 0 : index
      %94 = vector.load %arg13[%c0_69, %c0_70] : memref<16x15xf32, #tpu.memory_space<vmem>>, vector<16x15xf32>
      %95 = vector.shape_cast %94 : vector<16x15xf32> to vector<1x16x15xf32>
      %cst_71 = arith.constant dense<0.000000e+00> : vector<1xf32>
      %96 = vector.multi_reduction <add>, %95, %cst_71 [1, 2] : vector<1x16x15xf32> to vector<1xf32>
      %97 = vector.shape_cast %96 : vector<1xf32> to vector<1x1x1xf32>
      %98 = vector.extract %97[0, 0, 0] : f32 from vector<1x1x1xf32>
      %cst_72 = arith.constant 0.00104166672 : f32
      %99 = arith.mulf %93, %cst_72 : f32
      %cst_73 = arith.constant 0.00104166672 : f32
      %100 = arith.mulf %98, %cst_73 : f32
      %101 = arith.addf %99, %100 : f32
      %cst_74 = arith.constant 2.000000e+00 : f32
      %102 = arith.mulf %cst_74, %101 : f32
      %cst_75 = arith.constant 2.000000e+00 : f32
      %103 = arith.divf %102, %cst_75 : f32
      %c0_76 = arith.constant 0 : index
      %c0_77 = arith.constant 0 : index
      %104 = vector.load %arg14[%c0_76, %c0_77] : memref<1x1xf32, #tpu.memory_space<vmem>>, vector<1x1xf32>
      %105 = vector.shape_cast %104 : vector<1x1xf32> to vector<1x1x1xf32>
      %cst_78 = arith.constant dense<0.000000e+00> : vector<1xf32>
      %106 = vector.multi_reduction <add>, %105, %cst_78 [1, 2] : vector<1x1x1xf32> to vector<1xf32>
      %107 = vector.shape_cast %106 : vector<1xf32> to vector<1x1x1xf32>
      %108 = vector.extract %107[0, 0, 0] : f32 from vector<1x1x1xf32>
      %cst_79 = arith.constant 5.000000e-01 : f32
      %109 = arith.mulf %108, %cst_79 : f32
      %cst_80 = arith.constant 1.000000e+01 : f32
      %110 = arith.mulf %cst_80, %109 : f32
      %cst_81 = arith.constant 1.000000e+01 : f32
      %111 = arith.mulf %cst_81, %88 : f32
      %112 = arith.addf %110, %111 : f32
      %cst_82 = arith.constant 5.000000e+00 : f32
      %113 = arith.mulf %cst_82, %103 : f32
      %114 = arith.addf %112, %113 : f32
      %cst_83 = arith.constant 1.000000e+00 : f32
      %115 = arith.mulf %cst_83, %82 : f32
      %116 = arith.addf %114, %115 : f32
      %cst_84 = arith.constant 1.000000e+00 : f32
      %117 = arith.mulf %cst_84, %76 : f32
      %118 = arith.addf %116, %117 : f32
      %c0_85 = arith.constant 0 : index
      %119 = memref.load %arg8[%c0_85] : memref<6xf32, #tpu.memory_space<smem>>
      memref.store %76, %arg8[%c0_85] : memref<6xf32, #tpu.memory_space<smem>>
      %c1 = arith.constant 1 : index
      %120 = memref.load %arg8[%c1] : memref<6xf32, #tpu.memory_space<smem>>
      memref.store %82, %arg8[%c1] : memref<6xf32, #tpu.memory_space<smem>>
      %c2 = arith.constant 2 : index
      %121 = memref.load %arg8[%c2] : memref<6xf32, #tpu.memory_space<smem>>
      memref.store %88, %arg8[%c2] : memref<6xf32, #tpu.memory_space<smem>>
      %c3 = arith.constant 3 : index
      %122 = memref.load %arg8[%c3] : memref<6xf32, #tpu.memory_space<smem>>
      memref.store %103, %arg8[%c3] : memref<6xf32, #tpu.memory_space<smem>>
      %c4 = arith.constant 4 : index
      %123 = memref.load %arg8[%c4] : memref<6xf32, #tpu.memory_space<smem>>
      memref.store %109, %arg8[%c4] : memref<6xf32, #tpu.memory_space<smem>>
      %c5 = arith.constant 5 : index
      %124 = memref.load %arg8[%c5] : memref<6xf32, #tpu.memory_space<smem>>
      memref.store %118, %arg8[%c5] : memref<6xf32, #tpu.memory_space<smem>>
    } else {
    }
    return
  }
  func.func @transform_0(%arg0: i32) -> (i32, i32, i32) {
    %c0_i32 = arith.constant 0 : i32
    %c0_i32_0 = arith.constant 0 : i32
    %c0_i32_1 = arith.constant 0 : i32
    return %arg0, %c0_i32, %c0_i32_0 : i32, i32, i32
  }
  func.func @transform_1(%arg0: i32) -> (i32, i32, i32) {
    %c0_i32 = arith.constant 0 : i32
    %c0_i32_0 = arith.constant 0 : i32
    %c0_i32_1 = arith.constant 0 : i32
    return %arg0, %c0_i32, %c0_i32_0 : i32, i32, i32
  }
  func.func @transform_2(%arg0: i32) -> (i32, i32, i32) {
    %c0_i32 = arith.constant 0 : i32
    %c0_i32_0 = arith.constant 0 : i32
    %c0_i32_1 = arith.constant 0 : i32
    return %arg0, %c0_i32, %c0_i32_0 : i32, i32, i32
  }
  func.func @transform_3(%arg0: i32) -> (i32, i32, i32) {
    %c0_i32 = arith.constant 0 : i32
    %c0_i32_0 = arith.constant 0 : i32
    %c0_i32_1 = arith.constant 0 : i32
    return %arg0, %c0_i32, %c0_i32_0 : i32, i32, i32
  }
  func.func @transform_4(%arg0: i32) -> (i32, i32, i32) {
    %c0_i32 = arith.constant 0 : i32
    %c0_i32_0 = arith.constant 0 : i32
    %c0_i32_1 = arith.constant 0 : i32
    return %arg0, %c0_i32, %c0_i32_0 : i32, i32, i32
  }
  func.func @transform_5(%arg0: i32) -> (i32, i32, i32) {
    %c0_i32 = arith.constant 0 : i32
    %c0_i32_0 = arith.constant 0 : i32
    %c0_i32_1 = arith.constant 0 : i32
    %c0_i32_2 = arith.constant 0 : i32
    return %c0_i32, %c0_i32_0, %c0_i32_1 : i32, i32, i32
  }
  func.func @transform_6(%arg0: i32) -> i32 {
    %c0_i32 = arith.constant 0 : i32
    %c0_i32_0 = arith.constant 0 : i32
    return %c0_i32 : i32
  }
  func.func @transform_7(%arg0: i32) -> i32 {
    %c0_i32 = arith.constant 0 : i32
    %c0_i32_0 = arith.constant 0 : i32
    return %c0_i32 : i32
  }
}

</mosaic_0001>

<bundles_post_ra>
// kernel: tpu_custom_call.1
= control target key start
LH: loop header
LB: loop body
LE: loop exit
PB: predicated region body
PF: predicated region fallthrough
CT: control target
= control target key end

     0   :  { %s1993_s0 = inlined_call_operand.hbm [shape: f32[2,8,128], index: 0, kind: input, shape index: {}]   ;;  %s1994_s1 = inlined_call_operand.hbm [shape: f32[2,8,128], index: 1, kind: input, shape index: {}]   ;;  %s1995_s2 = inlined_call_operand.hbm [shape: f32[8,16,16], index: 2, kind: input, shape index: {}]   ;;  %s1996_s3 = inlined_call_operand.hbm [shape: f32[8,16,16], index: 3, kind: input, shape index: {}]   ;;  %s1997_s4 = inlined_call_operand.hbm [shape: f32[8,16,16], index: 4, kind: input, shape index: {}]   ;;  %s1998_s5 = inlined_call_operand.hbm [shape: f32[4,16,16], index: 5, kind: input, shape index: {}]   ;;  %s1999_s6 = inlined_call_operand.<no memory space> [shape: f32[1], index: 6, kind: input, shape index: {}]   ;;  %s2000_s7 = inlined_call_operand.hbm [shape: f32[6], index: 7, kind: output, shape index: {}]  }
   0x1   :  { %2017 = sst [smem:[#allocation29_spill]] %s1994_s1 }
   0x2   :  { %2018 = sst [smem:[#allocation30_spill]] %s1996_s3 }
   0x3   :  { %2019 = sst [smem:[#allocation31_spill]] %s2000_s7 }
   0x4   :  { %12 = sst [smem:[#allocation8]] %s1999_s6 }
   0x5   :  { %13 = vsyncpa [#allocation10], 0 }
   0x6   :  { %15 = vsyncpa [#allocation10 + $0x1], 0 }
   0x7   :  { %16 = vsyncpa [#allocation13], 0 }
   0x8   :  { %18 = vsyncpa [#allocation13 + $0x1], 0 }
   0x9   :  { %19 = vsyncpa [#allocation16], 0 }
   0xa   :  { %21 = vsyncpa [#allocation16 + $0x1], 0 }
   0xb   :  { %22 = vsyncpa [#allocation19], 0 }
   0xc   :  { %23 = vsyncpa [#allocation11], 0  ;;  %s1470_s26 = smov 0   ;;  %s1472_s27 = smov 0  }
   0xd   :  { %s1474_s28 = smov 0   ;;  %s1476_s29 = smov 0  }
   0xe LB: > { %2020 = sst [smem:[#allocation26_spill]] %s1409_s28  ;;  %s1491_s6 = sadd.s32 1, %s1413_s29   ;;  %s1413_s29 = sphi %s1476_s29, %s2041_s29   ;;  %s1409_s28 = sphi %s1474_s28, %s2043_s28   ;;  %s1405_s27 = sphi %s1472_s27, %s2045_s27   ;;  %s1401_s26 = sphi %s1470_s26, %s2044_s26  }
   0xf   : > { %2021 = sst [smem:[#allocation27_spill]] %s1491_s6  ;;  %s36_s30 = sadd.s32 1, %s1409_s28 }
  0x10   : > { %s33_s8 = ssub.s32 %s1413_s29, %s1491_s6  ;;  %p43_p0 = scmp.ne.s32.totalorder %s1409_s28, %s1405_s27 }
  0x11   : > { %p34_p1 = scmp.eq.s32.totalorder %s33_s8, 0  ;;  %p44_p2 = scmp.eq.s32.totalorder %s1413_s29, 0 }
  0x12   : > { %p1126_p3 = scmp.lt.s32.totalorder %s1413_s29, 2  ;;  %s1504_s10 = sand.u32 1, %s1409_s28  }
  0x13   : > { %s1501_s9 = scalar_select %p34_p1, %s1409_s28, %s36_s30  }
  0x14   : > { %p45_p4 = por %p44_p2, %p43_p0  ;;  %s2001_s11 = sshll.u32 %s1504_s10, 3 }
  0x15   : > { %2022 = sst [smem:[#allocation28_spill]] %s1501_s9  ;;  %s1041_s12 = sshll.u32 %s1413_s29, 7 }
  0x16   : > { %p1508_p5 = pnand %p1126_p3, %p45_p4  ;;  %s274_s14 = sand.u32 1, %s1413_s29  }
  0x17   : > { %s2024_s1 = sld [smem:[#allocation29_spill]]  ;;  %s278_s18 = scalar_lea.vmem [#allocation12], %s2001_s11 }
  0x18   : > { %s2023_s13 = scalar_select %p1508_p5, 1, 0 }
  0x19   : > { %s285_s19 = sshll.u32 %s278_s18, 4  ;;  %s1523_s20 = sshll.u32 %s1504_s10, 6  ;;  %s1525_s19 = int_to_ptr.vmem [resolvable:$true] %s285_s19 }
  0x1a   : > { %s1529_s21 = scalar_lea.sflag [#allocation13], %s274_s14  ;;  %p1535_p7 = pneg %p1508_p5 }
  0x1c   : > { %s2025_s23 = scalar_select %p1535_p7, 1, 0 }
  0x1d   : > { %s1518_s17 = scalar_lea.hbm %s2024_s1, %s1041_s12  ;;  %s1178_s30 = scalar_lea.hbm %s2024_s1, 256 }
  0x1e   : > { %s1173_s22 = scalar_lea.hbm %s1518_s17, 128  ;;  %p1179_p10 = scmp.lt.u32.totalorder %s1518_s17, %s2024_s1 }
  0x1f   : > { %p1174_p6 = scmp.ne.s32.totalorder %s1518_s17, %s1173_s22  ;;  %p1180_p11 = scmp.lt.u32.totalorder %s1178_s30, %s1173_s22 }
  0x20   : > { %p1182_p13 = scmp.lt.u32.totalorder %s1173_s22, %s1518_s17 }
  0x21   : > { %p1176_p8 = pnand %p1535_p7, %p1174_p6  ;;  %p1181_p12 = por %p1180_p11, %p1179_p10 }
  0x23   : > { %p1177_p9 = pneg %p1176_p8  ;;  %p1183_p0 = por %p1182_p13, %p1181_p12 }
  0x25   : > { %p1184_p1 = pnand %p1183_p0, %p1177_p9 }
  0x27   : > { %1187 = shalt.err (!%p1184_p1)
}
  0x28   : > { %s1188_s16 = scalar_lea.vmem %s1525_s19, 128  ;;  %s1415_s18 = smov [#allocation12]  }
  0x29   : > { %p1189_p2 = scmp.ne.s32.totalorder %s1525_s19, %s1188_s16  ;;  %s1193_s24 = sshll.u32 %s1415_s18, 4  ;;  %s1194_s24 = int_to_ptr.vmem [resolvable:$false] %s1193_s24 }
  0x2a   : > { %s1195_s25 = scalar_lea.vmem %s1194_s24, 256  ;;  %p1196_p6 = scmp.lt.s32.totalorder %s1525_s19, %s1194_s24 }
  0x2b   : > { %p1191_p3 = pnand %p1189_p2, %p1535_p7  ;;  %p1197_p8 = scmp.lt.s32.totalorder %s1195_s25, %s1188_s16 }
  0x2d   : > { %p1192_p4 = pneg %p1191_p3  ;;  %p1198_p10 = por %p1197_p8, %p1196_p6 }
  0x2f   : > { %p1199_p11 = pnand %p1198_p10, %p1192_p4 }
  0x31   : > { %1202 = shalt.err (!%p1199_p11)
}
  0x32   : > { %1115 = dma.hbm_to_vmem [thread:$0]  (!%p1508_p5), %s1518_s17, 128, %s1525_s19, %s1529_s21  }
  0x33   : > { %s1560_s22 = sshll.u32 %s1413_s29, 10  ;;  %s2026_s3 = sld [smem:[#allocation30_spill]] }
  0x34   : > { %s318_s16 = scalar_lea.vmem [#allocation15], %s1523_s20  ;;  %s1573_s24 = scalar_lea.sflag [#allocation16], %s274_s14 }
  0x35   : > { %s326_s18 = sshll.u32 %s318_s16, 4  ;;  %s1569_s18 = int_to_ptr.vmem [resolvable:$true] %s326_s18 }
  0x39   : > { %s1566_s15 = scalar_lea.hbm %s2026_s3, %s1560_s22  ;;  %s1208_s30 = scalar_lea.hbm %s2026_s3, 2048 }
  0x3a   : > { %s1203_s17 = scalar_lea.hbm %s1566_s15, 1024  ;;  %p1209_p0 = scmp.lt.u32.totalorder %s1566_s15, %s2026_s3 }
  0x3b   : > { %p1204_p9 = scmp.ne.s32.totalorder %s1566_s15, %s1203_s17  ;;  %p1210_p1 = scmp.lt.u32.totalorder %s1208_s30, %s1203_s17 }
  0x3c   : > { %p1212_p3 = scmp.lt.u32.totalorder %s1203_s17, %s1566_s15 }
  0x3d   : > { %p1206_p12 = pnand %p1204_p9, %p1535_p7  ;;  %p1211_p2 = por %p1210_p1, %p1209_p0 }
  0x3f   : > { %p1207_p13 = pneg %p1206_p12  ;;  %p1213_p4 = por %p1212_p3, %p1211_p2 }
  0x41   : > { %p1214_p6 = pnand %p1213_p4, %p1207_p13 }
  0x43   : > { %1217 = shalt.err (!%p1214_p6)
}
  0x44   : > { %s1218_s14 = scalar_lea.vmem %s1569_s18, 1024  ;;  %s1416_s16 = smov [#allocation15]  }
  0x45   : > { %p1219_p8 = scmp.ne.s32.totalorder %s1569_s18, %s1218_s14  ;;  %s1223_s19 = sshll.u32 %s1416_s16, 4  ;;  %s1224_s19 = int_to_ptr.vmem [resolvable:$false] %s1223_s19 }
  0x46   : > { %s1225_s11 = scalar_lea.vmem %s1224_s19, 2048  ;;  %p1226_p9 = scmp.lt.s32.totalorder %s1569_s18, %s1224_s19 }
  0x47   : > { %p1221_p10 = pnand %p1219_p8, %p1535_p7  ;;  %p1227_p12 = scmp.lt.s32.totalorder %s1225_s11, %s1218_s14 }
  0x49   : > { %p1222_p11 = pneg %p1221_p10  ;;  %p1228_p0 = por %p1227_p12, %p1226_p9 }
  0x4b   : > { %p1229_p1 = pnand %p1228_p0, %p1222_p11 }
  0x4d   : > { %1232 = shalt.err (!%p1229_p1)
}
  0x4e   : > { %s2002_s17 = smov 128   ;;  %s2004_s25 = smov 8  }
  0x4f   : > { %1121 = dma.hbm_to_vmem [thread:$0]  (!%p1508_p5), %s1566_s15, 1024, %s1569_s18, %s1573_s24, %s2002_s17, %s2002_s17, %s2004_s25  }
  0x50   : > { %s1601_s30 = sadd.s32 4294967295, %s1413_s29   ;;  %p49_p13 = scmp.ne.s32.totalorder %s1405_s27, %s1401_s26 }
  0x51   : > { %p2010_p2 = scmp.eq.s32.totalorder %s1601_s30, 0  ;;  %p1037_p3 = scmp.ge.s32.totalorder %s1413_s29, 1 }
  0x52   : > { %p227_p4 = scmp.lt.s32.totalorder %s1413_s29, 3  ;;  %s1419_s18 = smov [#allocation18]  }
  0x53   : > { %p1610_p6 = por %p2010_p2, %p49_p13  ;;  %s239_s14 = sshll.u32 %s1419_s18, 4  ;;  %s1621_s14 = int_to_ptr.vmem [resolvable:$true] %s239_s14 }
  0x54   : > { %p1615_p10 = pnand %p1037_p3, %p227_p4  ;;  %s1628_s19 = scalar_lea.hbm %s1993_s0, %s1041_s12 }
  0x55   : > { %s2027_s8 = scalar_select %p1610_p6, 1, 0 }
  0x56   : > { %s2028_s15 = scalar_select %p1615_p10, 1, 0 }
  0x57   : > { %p1105_p11 = pneg %p1615_p10  ;;  %s2030_s17 = sshll.u32 %s1504_s10, 3 }
  0x58   : > { %s260_s25 = scalar_lea.vmem [#allocation9], %s2030_s17  ;;  %s1644_s29 = scalar_lea.hbm %s1995_s2, %s1560_s22 }
  0x59   : > { %p1632_p9 = pnand %p1105_p11, %p2010_p2  ;;  %s267_s1 = sshll.u32 %s260_s25, 4  ;;  %s1638_s1 = int_to_ptr.vmem [resolvable:$true] %s267_s1 }
  0x5a   : > { %s296_s9 = scalar_lea.vmem [#allocation14], %s1523_s20  ;;  %s1233_s28 = scalar_lea.hbm %s1998_s5, 1024 }
  0x5b   : > { %s1647_s26 = sshll.u32 %s296_s9, 4  ;;  %p1234_p12 = scmp.ne.s32.totalorder %s1998_s5, %s1233_s28  ;;  %s1696_s26 = int_to_ptr.vmem [resolvable:$true] %s1647_s26 }
  0x5c   : > { %p1235_p0 = pneg %p1632_p9  ;;  %p1240_p3 = scmp.lt.u32.totalorder %s1233_s28, %s1998_s5 }
  0x5e   : > { %p1236_p1 = pnand %p1235_p0, %p1234_p12 }
  0x60   : > { %p1237_p13 = pneg %p1236_p1 }
  0x62   : > { %p1242_p4 = pnand %p1240_p3, %p1237_p13 }
  0x64   : > { %1245 = shalt.err (!%p1242_p4)
}
  0x65   : > { %s1246_s3 = scalar_lea.vmem %s1621_s14, 1024  ;;  %p1254_p6 = scmp.lt.s32.totalorder %s1621_s14, %s1621_s14 }
  0x66   : > { %p1247_p11 = scmp.ne.s32.totalorder %s1621_s14, %s1246_s3  ;;  %p1255_p10 = scmp.lt.s32.totalorder %s1246_s3, %s1246_s3 }
  0x68   : > { %p1249_p8 = pnand %p1247_p11, %p1235_p0  ;;  %p1256_p5 = por %p1255_p10, %p1254_p6 }
  0x6a   : > { %p1250_p2 = pneg %p1249_p8 }
  0x6c   : > { %p1257_p7 = pnand %p1256_p5, %p1250_p2 }
  0x6e   : > { %1260 = shalt.err (!%p1257_p7)
}
  0x6f   : > { %s2031_s7 = smov 8   ;;  %s2032_s6 = smov 128  }
  0x70   : > { %1108 = dma.hbm_to_vmem [thread:$0]  (!%p1632_p9), %s1998_s5, 1024, %s1621_s14, [#allocation19], %s2032_s6, %s2032_s6, %s2031_s7  }
  0x71   : > { %s257_s18 = scalar_lea.sflag [#allocation10], %s1504_s10  ;;  %s1261_s12 = scalar_lea.hbm %s1628_s19, 128 }
  0x72   : > { %p1262_p5 = scmp.ne.s32.totalorder %s1628_s19, %s1261_s12  ;;  %p2033_p7 = scmp.ne.s32.totalorder %s2025_s23, 0 }
  0x73   : > { %s1266_s17 = scalar_lea.hbm %s1993_s0, 256  ;;  %p1267_p8 = scmp.lt.u32.totalorder %s1628_s19, %s1993_s0 }
  0x74   : > { %p1264_p2 = pnand %p1262_p5, %p2033_p7  ;;  %p1268_p10 = scmp.lt.u32.totalorder %s1266_s17, %s1261_s12 }
  0x75   : > { %p1270_p0 = scmp.lt.u32.totalorder %s1261_s12, %s1628_s19 }
  0x76   : > { %p1265_p6 = pneg %p1264_p2  ;;  %p1269_p12 = por %p1268_p10, %p1267_p8 }
  0x78   : > { %p1271_p1 = por %p1270_p0, %p1269_p12 }
  0x7a   : > { %p1272_p13 = pnand %p1271_p1, %p1265_p6 }
  0x7c   : > { %1275 = shalt.err (!%p1272_p13)
}
  0x7d   : > { %s1276_s10 = scalar_lea.vmem %s1638_s1, 128  ;;  %s1420_s14 = smov [#allocation9]  }
  0x7e   : > { %p1277_p9 = scmp.ne.s32.totalorder %s1638_s1, %s1276_s10  ;;  %s1281_s28 = sshll.u32 %s1420_s14, 4  ;;  %s1282_s28 = int_to_ptr.vmem [resolvable:$false] %s1281_s28 }
  0x7f   : > { %s1283_s9 = scalar_lea.vmem %s1282_s28, 256  ;;  %p1284_p11 = scmp.lt.s32.totalorder %s1638_s1, %s1282_s28 }
  0x80   : > { %p1279_p3 = pnand %p1277_p9, %p2033_p7  ;;  %p1285_p5 = scmp.lt.s32.totalorder %s1283_s9, %s1276_s10 }
  0x82   : > { %p1280_p4 = pneg %p1279_p3  ;;  %p1286_p2 = por %p1285_p5, %p1284_p11 }
  0x84   : > { %p1287_p8 = pnand %p1286_p2, %p1280_p4 }
  0x86   : > { %1290 = shalt.err (!%p1287_p8)
}
  0x87   : > { %p2034_p6 = scmp.ne.s32.totalorder %s2023_s13, 0  ;;  %s1702_s16 = scalar_lea.hbm %s1997_s4, %s1560_s22 }
  0x88   : > { %s1291_s17 = scalar_lea.hbm %s1644_s29, 1024  ;;  %s1296_s10 = scalar_lea.hbm %s1995_s2, 2048 }
  0x89   : > { %1112 = dma.hbm_to_vmem [thread:$0]  (!%p2034_p6), %s1628_s19, 128, %s1638_s1, %s257_s18  }
  0x8a   : > { %p1292_p10 = scmp.ne.s32.totalorder %s1644_s29, %s1291_s17  ;;  %p1297_p1 = scmp.lt.u32.totalorder %s1644_s29, %s1995_s2 }
  0x8b   : > { %p1298_p13 = scmp.lt.u32.totalorder %s1296_s10, %s1291_s17  ;;  %p1300_p3 = scmp.lt.u32.totalorder %s1291_s17, %s1644_s29 }
  0x8c   : > { %p1294_p12 = pnand %p1292_p10, %p2033_p7 }
  0x8d   : > { %p1299_p9 = por %p1298_p13, %p1297_p1 }
  0x8e   : > { %p1295_p0 = pneg %p1294_p12 }
  0x8f   : > { %p1301_p4 = por %p1300_p3, %p1299_p9 }
  0x91   : > { %p1302_p11 = pnand %p1301_p4, %p1295_p0 }
  0x93   : > { %1305 = shalt.err (!%p1302_p11)
}
  0x94   : > { %s1306_s1 = scalar_lea.vmem %s1696_s26, 1024  ;;  %s1421_s22 = smov [#allocation14]  }
  0x95   : > { %p1307_p5 = scmp.ne.s32.totalorder %s1696_s26, %s1306_s1  ;;  %s1311_s19 = sshll.u32 %s1421_s22, 4  ;;  %s1312_s19 = int_to_ptr.vmem [resolvable:$false] %s1311_s19 }
  0x96   : > { %s1313_s18 = scalar_lea.vmem %s1312_s19, 2048  ;;  %p1314_p10 = scmp.lt.s32.totalorder %s1696_s26, %s1312_s19 }
  0x97   : > { %p1309_p2 = pnand %p1307_p5, %p2033_p7  ;;  %p1315_p12 = scmp.lt.s32.totalorder %s1313_s18, %s1306_s1 }
  0x99   : > { %p1310_p8 = pneg %p1309_p2  ;;  %p1316_p1 = por %p1315_p12, %p1314_p10 }
  0x9b   : > { %p1317_p13 = pnand %p1316_p1, %p1310_p8 }
  0x9d   : > { %1320 = shalt.err (!%p1317_p13)
}
  0x9e   : > { %1118 = dma.hbm_to_vmem [thread:$0]  (!%p2034_p6), %s1644_s29, 1024, %s1696_s26, %s1529_s21, %s2032_s6, %s2032_s6, %s2031_s7  }
  0x9f   : > { %s340_s9 = scalar_lea.vmem [#allocation17], %s1523_s20  ;;  %s1321_s11 = scalar_lea.hbm %s1702_s16, 1024 }
  0xa0   : > { %s348_s12 = sshll.u32 %s340_s9, 4  ;;  %p1322_p0 = scmp.ne.s32.totalorder %s1702_s16, %s1321_s11  ;;  %s1730_s12 = int_to_ptr.vmem [resolvable:$true] %s348_s12 }
  0xa1   : > { %s1326_s3 = scalar_lea.hbm %s1997_s4, 2048  ;;  %p1327_p4 = scmp.lt.u32.totalorder %s1702_s16, %s1997_s4 }
  0xa2   : > { %p1324_p9 = pnand %p1322_p0, %p2033_p7  ;;  %p1328_p11 = scmp.lt.u32.totalorder %s1326_s3, %s1321_s11 }
  0xa3   : > { %p1330_p2 = scmp.lt.u32.totalorder %s1321_s11, %s1702_s16 }
  0xa4   : > { %p1325_p3 = pneg %p1324_p9  ;;  %p1329_p5 = por %p1328_p11, %p1327_p4 }
  0xa6   : > { %p1331_p8 = por %p1330_p2, %p1329_p5 }
  0xa8   : > { %p1332_p10 = pnand %p1331_p8, %p1325_p3 }
  0xaa   : > { %1335 = shalt.err (!%p1332_p10)
}
  0xab   : > { %s1336_s20 = scalar_lea.vmem %s1730_s12, 1024  ;;  %s1422_s21 = smov [#allocation17]  }
  0xac   : > { %p1337_p12 = scmp.ne.s32.totalorder %s1730_s12, %s1336_s20  ;;  %s1341_s29 = sshll.u32 %s1422_s21, 4  ;;  %s1342_s29 = int_to_ptr.vmem [resolvable:$false] %s1341_s29 }
  0xad   : > { %s1343_s26 = scalar_lea.vmem %s1342_s29, 2048  ;;  %p1344_p0 = scmp.lt.s32.totalorder %s1730_s12, %s1342_s29 }
  0xae   : > { %p1339_p1 = pnand %p1337_p12, %p2033_p7  ;;  %p1345_p9 = scmp.lt.s32.totalorder %s1343_s26, %s1336_s20 }
  0xb0   : > { %p1340_p13 = pneg %p1339_p1  ;;  %p1346_p4 = por %p1345_p9, %p1344_p0 }
  0xb2   : > { %p1347_p11 = pnand %p1346_p4, %p1340_p13 }
  0xb4   : > { %1350 = shalt.err (!%p1347_p11)
}
  0xb5   : > { %1124 = dma.hbm_to_vmem [thread:$0]  (!%p2034_p6), %s1702_s16, 1024, %s1730_s12, %s1573_s24, %s2032_s6, %s2032_s6, %s2031_s7  }
  0xb6   : > { %p2035_p7 = scmp.ne.s32.totalorder %s2028_s15, 0 }
  0xb7   : > { %s362_s23 = sand.u32 (!%p2035_p7), 1, %s1405_s27   ;;  %p2036_p3 = scmp.ne.s32.totalorder (!%p2035_p7), %s2027_s8, 0 }
  0xb8   : > { %360 = sbr.rel (%p2035_p7) target bundleno = 720 (0x2d0), region = 48  ;;  %s1057_s28 = sshll.u32 (!%p2035_p7), %s362_s23, 3 }
  0xb9   : > { %s363_s1 = scalar_lea.sflag (!%p2035_p7), [#allocation10], %s362_s23  ;;  %s1760_s22 = scalar_lea.vmem (!%p2035_p7), [#allocation9], %s1057_s28 }
  0xbf   : > { %1380 = dma.done.wait (%p2036_p3), %s363_s1, 128  }
  0xc0   : > { %1382 = vsyncadd (%p2036_p3), %s363_s1, 4294967168  ;;  %s371_s13 = sand.u32 1, %s1601_s30   ;;  %s1767_s24 = scalar_lea.vmem [#allocation12], %s1057_s28 }
  0xc1   : > { %s372_s19 = scalar_lea.sflag [#allocation13], %s371_s13 }
  0xc2   : > { %1384 = dma.done.wait (%p2036_p3), %s372_s19, 1152  }
  0xc3   : > { %1386 = vsyncadd (%p2036_p3), %s372_s19, 4294966144  ;;  %s1059_s15 = sshll.u32 %s362_s23, 6  ;;  %s390_s6 = scalar_lea.sflag [#allocation16], %s371_s13 }
  0xc4   : > { %s1773_s7 = scalar_lea.vmem [#allocation14], %s1059_s15  ;;  %s1775_s16 = scalar_lea.vmem [#allocation15], %s1059_s15 }
  0xc5   : > { %1388 = dma.done.wait (%p2036_p3), %s390_s6, 2048  }
  0xc6   : > { %1390 = vsyncadd (%p2036_p3), %s390_s6, 4294965248  ;;  %s1781_s18 = scalar_lea.vmem [#allocation17], %s1059_s15  ;;  %p2037_p6 = scmp.eq.s32.totalorder %s1601_s30, 0 }
  0xc8   : > { %1392 = dma.done.wait (%p2037_p6), [#allocation19], 1024   ;;  %p2038_p5 = pmov %p2037_p6 }
  0xc9   : > { %p2039_p2 = scmp.ne.s32.totalorder %s1601_s30, 0 }
  0xca   : > { %1394 = vsyncadd (%p2038_p5), [#allocation19], 4294966272  ;;  %vm460_vm0 = vcmask (!%p2039_p2), 130048   ;;  %vm466_vm1 = vcmask (!%p2039_p2), 129024   ;;  %vm468_vm2 = vcmask (!%p2039_p2), 121856   ;;  %v1423_v0 = vmov (!%p2039_p2), 0.0  }
  0xcb   : > { %458 = sbr.rel (%p2039_p2) target bundleno = 210 (0xd2), region = 76  ;;  %459 = vst [vmem:[#allocation2] sm:$0xff] (!%p2039_p2), %v1423_v0  ;;  %461 = vst.msk [vmem:[#allocation3] sm:$0xff] (!%p2039_p2), %vm460_vm0, %v1423_v0  ;;  %vm471_vm3 = vcmask (!%p2039_p2), 0  }
  0xcc   : > { %462 = vst.msk [vmem:[#allocation3 + $0x8] sm:$0xff] (!%p2039_p2), %vm460_vm0, %v1423_v0  ;;  %463 = vst.msk [vmem:[#allocation4] sm:$0xff] (!%p2039_p2), %vm460_vm0, %v1423_v0 }
  0xcd   : > { %464 = vst.msk [vmem:[#allocation4 + $0x8] sm:$0xff] (!%p2039_p2), %vm460_vm0, %v1423_v0  ;;  %465 = vst.msk [vmem:[#allocation5] sm:$0xff] (!%p2039_p2), %vm460_vm0, %v1423_v0 }
  0xce   : > { %467 = vst.msk [vmem:[#allocation5 + $0x8] sm:$0x7f] (!%p2039_p2), %vm466_vm1, %v1423_v0 }
  0xcf   : > { %469 = vst.msk [vmem:[#allocation6] sm:$0xff] (!%p2039_p2), %vm468_vm2, %v1423_v0  ;;  %470 = vst.msk [vmem:[#allocation6 + $0x8] sm:$0xff] (!%p2039_p2), %vm468_vm2, %v1423_v0 }
  0xd0   : > { %472 = vst.msk [vmem:[#allocation7] sm:$0x1] (!%p2039_p2), %vm471_vm3, %v1423_v0 }
  0xd2 PF: > { %v1790_v1 = vld [vmem:[%s1781_s18 + $0x10] sm:$0xff]  ;;  %vm522_vm4 = vcmask 130048   ;;  %vm624_vm5 = vcmask 130049   ;;  %s1424_s8 = smov 1   ;;  %v1801_v7 = vld [vmem:[%s1781_s18] sm:$0xff]  ;;  %vm585_vm6 = vcmask 1040384  }
  0xd3   : > { %v724_v2 = vld [vmem:[#allocation18 + $0x10] sm:$0xff]  ;;  %656 = vrot.lane.b32.xlu1 %v1790_v1, %s1424_s8  ;;  %v589_v5 = vrot.slane %v1790_v1, 7  ;;  %v722_v8 = vld [vmem:[#allocation18] sm:$0xff]  ;;  %652 = vrot.lane.b32.xlu0 %v1801_v7, %s1424_s8  ;;  %v586_v13 = vrot.slane %v1801_v7, 7  ;;  %v1813_v15 = vld [vmem:[%s1781_s18 + $0x18] sm:$0xff]  ;;  %vm641_vm7 = vcmask 1046528  }
  0xd4   : > { %v482_v3 = vld [vmem:[%s1773_s7 + $0x10] sm:$0xff]  ;;  %v1798_v6 = vmul.f32 %v724_v2, %v1790_v1  ;;  %v480_v11 = vld [vmem:[%s1773_s7] sm:$0xff]  ;;  %v1810_v14 = vmul.f32 %v722_v8, %v1801_v7  ;;  %v590_v19 = vrot.slane %v1813_v15, 7  ;;  %v725_v20 = vld [vmem:[#allocation18 + $0x18] sm:$0xff]  ;;  %vm650_vm8 = vcmask 129024   ;;  %s1425_s9 = smov 127  }
  0xd5   : > { %v490_v4 = vld [vmem:[%s1775_s16 + $0x10] sm:$0xff]  ;;  %v488_v12 = vld [vmem:[%s1775_s16] sm:$0xff]  ;;  %v608_v16 = vsub.f32 %v1790_v1, %v589_v5  ;;  %v483_v21 = vld [vmem:[%s1773_s7 + $0x18] sm:$0xff]  ;;  %v606_v25 = vsub.f32 %v1801_v7, %v586_v13  ;;  %v1822_v26 = vmul.f32 %v725_v20, %v1813_v15  ;;  %vm694_vm9 = vcmask 130056   ;;  %s764_s12 = sld [smem:[#allocation8]]  ;;  %p1064_p8 = scmp.ne.s32.totalorder %s1601_s30, 1 }
  0xd6   : > { %v506_v9 = vsub.f32 %v482_v3, %v490_v4  ;;  %v543_v10 = vsub.f32 %v1790_v1, %v490_v4  ;;  %v504_v17 = vsub.f32 %v480_v11, %v488_v12  ;;  %v541_v18 = vsub.f32 %v1801_v7, %v488_v12  ;;  %v491_v22 = vld [vmem:[%s1775_s16 + $0x18] sm:$0xff]  ;;  %v1825_v27 = vld [vmem:[%s1781_s18 + $0x8] sm:$0xff]  ;;  %v1843_v44 = vld [vmem:[%s1781_s18 + $0x20] sm:$0xff] }
  0xd7   : > { %v618_v28 = vmul.f32 %v608_v16, %v608_v16  ;;  %658 = vrot.lane.b32.xlu1 %v1813_v15, %s1424_s8  ;;  %v507_v31 = vsub.f32 %v483_v21, %v491_v22  ;;  %v616_v34 = vmul.f32 %v606_v25, %v606_v25  ;;  %v544_v35 = vsub.f32 %v1813_v15, %v491_v22  ;;  %v723_v36 = vld [vmem:[#allocation18 + $0x8] sm:$0xff]  ;;  %v484_v59 = vld [vmem:[%s1773_s7 + $0x20] sm:$0xff]  ;;  %v1865_v61 = vld [vmem:[%s1781_s18 + $0x38] sm:$0xff] }
  0xd8   : > { %v516_v23 = vmul.f32 %v506_v9, %v506_v9  ;;  %v553_v24 = vmul.f32 %v543_v10, %v543_v10  ;;  %v514_v29 = vmul.f32 %v504_v17, %v504_v17  ;;  %v551_v30 = vmul.f32 %v541_v18, %v541_v18  ;;  %654 = vrot.lane.b32.xlu0 %v1825_v27, %s1424_s8  ;;  %v1835_v37 = vld [vmem:[%s1781_s18 + $0x28] sm:$0xff]  ;;  %v492_v60 = vld [vmem:[%s1775_s16 + $0x20] sm:$0xff]  ;;  %v1871_v3 = vld [vmem:[%s1781_s18 + $0x30] sm:$0xff] }
  0xd9   : > { %v626_v38 = vsel %vm624_vm5, %v618_v28, 0.0  ;;  %v517_v41 = vmul.f32 %v507_v31, %v507_v31  ;;  %v481_v42 = vld [vmem:[%s1773_s7 + $0x8] sm:$0xff]  ;;  %v625_v47 = vsel %vm624_vm5, %v616_v34, 0.0  ;;  %v554_v48 = vmul.f32 %v544_v35, %v544_v35  ;;  %v495_v31 = vld [vmem:[%s1775_s16 + $0x38] sm:$0xff] }
  0xda   : > { %v524_v32 = vsel %vm522_vm4, %v516_v23, 0.0  ;;  %v560_v33 = vsel %vm522_vm4, %v553_v24, 0.0  ;;  %v523_v39 = vsel %vm522_vm4, %v514_v29, 0.0  ;;  %v559_v40 = vsel %vm522_vm4, %v551_v30, 0.0  ;;  %v489_v43 = vld [vmem:[%s1775_s16 + $0x8] sm:$0xff]  ;;  %v487_v30 = vld [vmem:[%s1773_s7 + $0x38] sm:$0xff] }
  0xdb   : > { %v525_v45 = vadd.f32 %v524_v32, %v523_v39  ;;  %v1845_v46 = vadd.f32 %v560_v33, %v559_v40  ;;  %v485_v49 = vld [vmem:[%s1773_s7 + $0x28] sm:$0xff]  ;;  %v627_v51 = vadd.f32 %v626_v38, %v625_v47  ;;  %v531_v52 = vsel %vm522_vm4, %v517_v41, 0.0  ;;  %662 = vrot.lane.b32.xlu1 %v1835_v37, %s1424_s8 }
  0xdc   : > { %v493_v50 = vld [vmem:[%s1775_s16 + $0x28] sm:$0xff]  ;;  %v591_v53 = vsel %vm585_vm6, %v589_v5, %v590_v19  ;;  %v587_v54 = vrot.slane %v1825_v27, 7  ;;  %v567_v55 = vsel %vm522_vm4, %v554_v48, 0.0  ;;  %v1858_v57 = vmul.f32 %v723_v36, %v1825_v27  ;;  %660 = vrot.lane.b32.xlu0 %v1843_v44, %s1424_s8 }
  0xdd   : > { %v609_v56 = vsub.f32 %v1813_v15, %v591_v53  ;;  %v505_v58 = vsub.f32 %v481_v42, %v489_v43  ;;  %v542_v62 = vsub.f32 %v1825_v27, %v489_v43  ;;  %v593_v0 = vrot.slane %v1835_v37, 7 }
  0xde   : > { %v588_v63 = vsel %vm585_vm6, %v586_v13, %v587_v54  ;;  %v509_v2 = vsub.f32 %v485_v49, %v493_v50  ;;  %v546_v9 = vsub.f32 %v1835_v37, %v493_v50  ;;  %v592_v12 = vrot.slane %v1843_v44, 7 }
  0xdf   : > { %v619_v4 = vmul.f32 %v609_v56, %v609_v56  ;;  %v515_v5 = vmul.f32 %v505_v58, %v505_v58  ;;  %v607_v8 = vsub.f32 %v1825_v27, %v588_v63  ;;  %v552_v10 = vmul.f32 %v542_v62, %v542_v62  ;;  %666 = vrot.lane.b32.xlu1 %v1865_v61, %s1424_s8  ;;  %v486_v63 = vld [vmem:[%s1773_s7 + $0x30] sm:$0xff] }
  0xe0   : > { %v519_v11 = vmul.f32 %v509_v2, %v509_v2  ;;  %v508_v16 = vsub.f32 %v484_v59, %v492_v60  ;;  %v556_v19 = vmul.f32 %v546_v9, %v546_v9  ;;  %664 = vrot.lane.b32.xlu0 %v1871_v3, %s1424_s8  ;;  %v594_v23 = vsel %vm585_vm6, %v592_v12, %v593_v0  ;;  %v494_v0 = vld [vmem:[%s1775_s16 + $0x30] sm:$0xff]  ;;  %v726_v2 = vld [vmem:[#allocation18 + $0x20] sm:$0xff] }
  0xe1   : > { %v633_v13 = vsel %vm522_vm4, %v619_v4, 0.0  ;;  %v530_v17 = vsel %vm522_vm4, %v515_v5, 0.0  ;;  %v617_v18 = vmul.f32 %v607_v8, %v607_v8  ;;  %v566_v21 = vsel %vm522_vm4, %v552_v10, 0.0  ;;  %v513_v4 = vld [vmem:[#allocation3 + $0x8] sm:$0xff]  ;;  %v550_v5 = vld [vmem:[#allocation4 + $0x8] sm:$0xff] }
  0xe2   : > { %v532_v20 = vadd.f32 %v531_v52, %v530_v17  ;;  %v533_v22 = vsel %vm522_vm4, %v519_v11, 0.0  ;;  %v568_v24 = vadd.f32 %v567_v55, %v566_v21  ;;  %v569_v28 = vsel %vm522_vm4, %v556_v19, 0.0  ;;  %v727_v10 = vld [vmem:[#allocation18 + $0x28] sm:$0xff]  ;;  %v728_v19 = vld [vmem:[#allocation18 + $0x30] sm:$0xff] }
  0xe3   : > { %v632_v25 = vsel %vm522_vm4, %v617_v18, 0.0  ;;  %v610_v29 = vsub.f32 %v1843_v44, %v592_v12  ;;  %v611_v34 = vsub.f32 %v1835_v37, %v594_v23  ;;  %v518_v35 = vmul.f32 %v508_v16, %v508_v16 }
  0xe4   : > { %v634_v32 = vadd.f32 %v633_v13, %v632_v25  ;;  %v534_v33 = vadd.f32 %v533_v22, %v532_v20  ;;  %v570_v36 = vadd.f32 %v569_v28, %v568_v24  ;;  %v545_v39 = vsub.f32 %v1843_v44, %v492_v60  ;;  %v729_v20 = vld [vmem:[#allocation18 + $0x38] sm:$0xff] }
  0xe5   : > { %v620_v38 = vmul.f32 %v610_v29, %v610_v29  ;;  %v596_v40 = vrot.slane %v1865_v61, 7  ;;  %v621_v41 = vmul.f32 %v611_v34, %v611_v34  ;;  %v526_v42 = vsel %vm522_vm4, %v518_v35, 0.0 }
  0xe6   : > { %v511_v43 = vsub.f32 %v487_v30, %v495_v31  ;;  %v548_v47 = vsub.f32 %v1865_v61, %v495_v31  ;;  %v527_v49 = vadd.f32 %v526_v42, %v525_v45  ;;  %v555_v50 = vmul.f32 %v545_v39, %v545_v39  ;;  %v512_v31 = vld [vmem:[#allocation3] sm:$0xff] }
  0xe7   : > { %v628_v48 = vsel %vm624_vm5, %v620_v38, 0.0  ;;  %v595_v52 = vrot.slane %v1871_v3, 7  ;;  %v635_v53 = vsel %vm522_vm4, %v621_v41, 0.0  ;;  %v510_v17 = vsub.f32 %v486_v63, %v494_v0  ;;  %v615_v38 = vld [vmem:[#allocation5 + $0x8] sm:$0x7f] }
  0xe8   : > { %v629_v54 = vadd.f32 %v628_v48, %v627_v51  ;;  %v521_v55 = vmul.f32 %v511_v43, %v511_v43  ;;  %v558_v56 = vmul.f32 %v548_v47, %v548_v47  ;;  %v562_v58 = vsel %vm522_vm4, %v555_v50, 0.0  ;;  %v614_v43 = vld [vmem:[#allocation5] sm:$0xff] }
  0xe9   : > { %v636_v59 = vadd.f32 %v635_v53, %v634_v32  ;;  %v597_v60 = vsel %vm585_vm6, %v595_v52, %v596_v40  ;;  %v612_v62 = vsub.f32 %v1871_v3, %v595_v52  ;;  %v563_v45 = vadd.f32 %v562_v58, %v1845_v46  ;;  %v549_v32 = vld [vmem:[#allocation4] sm:$0xff] }
  0xea   : > { %v535_v8 = vsel %vm522_vm4, %v521_v55, 0.0  ;;  %v571_v51 = vsel %vm522_vm4, %v558_v56, 0.0  ;;  %v613_v9 = vsub.f32 %v1865_v61, %v597_v60  ;;  %v547_v18 = vsub.f32 %v1871_v3, %v494_v0 }
  0xeb   : > { %v536_v11 = vadd.f32 %v535_v8, %v534_v33  ;;  %v572_v12 = vadd.f32 %v571_v51, %v570_v36  ;;  %v622_v16 = vmul.f32 %v612_v62, %v612_v62  ;;  %v734_v46 = vmul.f32 %v726_v2, %v1843_v44 }
  0xec   : > { %v623_v13 = vmul.f32 %v613_v9, %v613_v9  ;;  %v735_v24 = vmul.f32 %v727_v10, %v1835_v37  ;;  %v520_v28 = vmul.f32 %v510_v17, %v510_v17  ;;  %v557_v29 = vmul.f32 %v547_v18, %v547_v18 }
  0xed   : > { %v538_v21 = vadd.f32 %v536_v11, %v513_v4  ;;  %v574_v22 = vadd.f32 %v572_v12, %v550_v5  ;;  %v630_v23 = vsel %vm624_vm5, %v622_v16, 0.0  ;;  %v736_v34 = vmul.f32 %v728_v19, %v1871_v3 }
  0xee   : > { %v637_v25 = vsel %vm522_vm4, %v623_v13, 0.0  ;;  %v631_v30 = vadd.f32 %v630_v23, %v629_v54  ;;  %v737_v35 = vmul.f32 %v729_v20, %v1865_v61  ;;  %v738_v36 = vsel %vm522_vm4, %v1810_v14, 0.0 }
  0xef   : > { %540 = vst.msk [vmem:[#allocation3 + $0x8] sm:$0xff] %vm522_vm4, %v538_v21  ;;  %576 = vst.msk [vmem:[#allocation4 + $0x8] sm:$0xff] %vm522_vm4, %v574_v22  ;;  %v638_v33 = vadd.f32 %v637_v25, %v636_v59  ;;  %v528_v39 = vsel %vm522_vm4, %v520_v28, 0.0  ;;  %v564_v40 = vsel %vm522_vm4, %v557_v29, 0.0  ;;  %v739_v42 = vsel %vm522_vm4, %v1798_v6, 0.0 }
  0xf0   : > { %v642_v41 = vrot.slane %v631_v30, 1  ;;  %v529_v47 = vadd.f32 %v528_v39, %v527_v49  ;;  %v565_v48 = vadd.f32 %v564_v40, %v563_v45  ;;  %v740_v52 = vadd.f32 %v739_v42, %v738_v36  ;;  %v473_v36 = vld [vmem:[%s1760_s22] sm:$0xff]  ;;  %v476_v42 = vld [vmem:[#allocation2] sm:$0xff] }
  0xf1   : > { %v643_v50 = vrot.slane %v638_v33, 1  ;;  %v741_v53 = vsel %vm522_vm4, %v734_v46, 0.0  ;;  %v743_v54 = vsel %vm522_vm4, %v736_v34, 0.0  ;;  %v745_v14 = vsel %vm522_vm4, %v1858_v57, 0.0 }
  0xf2   : > { %v746_v55 = vsel %vm522_vm4, %v1822_v26, 0.0  ;;  %v537_v56 = vadd.f32 %v529_v47, %v512_v31  ;;  %v573_v58 = vadd.f32 %v565_v48, %v549_v32  ;;  %v742_v49 = vadd.f32 %v741_v53, %v740_v52 }
  0xf3   : > { %v644_v59 = vsel %vm641_vm7, %v642_v41, %v643_v50  ;;  %v648_v6 = vadd.f32 %v643_v50, %v615_v38  ;;  %v747_v62 = vadd.f32 %v746_v55, %v745_v14  ;;  %v748_v63 = vsel %vm522_vm4, %v735_v24, 0.0 }
  0xf4   : > { %v647_v60 = vadd.f32 %v644_v59, %v614_v43  ;;  %539 = vst.msk [vmem:[#allocation3] sm:$0xff] %vm522_vm4, %v537_v56  ;;  %575 = vst.msk [vmem:[#allocation4] sm:$0xff] %vm522_vm4, %v573_v58  ;;  %v750_v57 = vsel %vm522_vm4, %v737_v35, 0.0  ;;  %v744_v26 = vadd.f32 %v743_v54, %v742_v49  ;;  %v765_v59 = vstv %s764_s12 }
  0xf5   : > { %651 = vst.msk [vmem:[#allocation5 + $0x8] sm:$0x7f] %vm650_vm8, %v648_v6  ;;  %v749_v0 = vadd.f32 %v748_v63, %v747_v62  ;;  %vm779_vm10 = vcmask 0   ;;  %vm719_vm11 = vcmask 121856  }
  0xf6   : > { %649 = vst.msk [vmem:[#allocation5] sm:$0xff] %vm522_vm4, %v647_v60  ;;  %v752_v45 = vsel %vm522_vm4, %v744_v26, 0.0 }
  0xf7   : > { %v751_v2 = vadd.f32 %v750_v57, %v749_v0 }
  0xf9   : > { %v753_v4 = vsel %vm522_vm4, %v751_v2, 0.0 }
  0xfa   : > { %v754_v5 = vadd.f32 %v753_v4, %v752_v45 }
  0xfc   : > { %v755_v8 = vrot.slane %v754_v5, 4 }
  0xfe   : > { %v756_v51 = vadd.f32 %v755_v8, %v754_v5  ;;  %v777_v5 = vld [vmem:[#allocation7] sm:$0x1] }
 0x100   : > { %v757_v9 = vrot.slane %v756_v51, 2 }
 0x102   : > { %v758_v10 = vadd.f32 %v757_v9, %v756_v51  ;;  %v684_v9 = vld [vmem:[#allocation6] sm:$0xff] }
 0x104   : > { %v759_v11 = vrot.slane %v758_v10, 1 }
 0x106   : > { %v760_v12 = vadd.f32 %v759_v11, %v758_v10 }
 0x108   : > { %v761_v16 = vsel %vm522_vm4, %v760_v12, 0.0  ;;  %v685_v12 = vld [vmem:[#allocation6 + $0x8] sm:$0xff] }
 0x109   : > { %762 = vadd.xlane.f32.xlu0 %v761_v16 }
 0x145   : > { %v657_v13 = vpop.permute.xlu1 %656  ;;  %v653_v17 = vpop.permute.xlu0 %652 }
 0x146   : > { %v678_v18 = vsub.f32 %v1790_v1, %v657_v13  ;;  %v676_v19 = vsub.f32 %v1801_v7, %v653_v17 }
 0x148   : > { %v688_v22 = vmul.f32 %v678_v18, %v678_v18  ;;  %v686_v23 = vmul.f32 %v676_v19, %v676_v19  ;;  %v811_v18 = vld [vmem:[#allocation4] sm:$0xff] (!%p1064_p8)  ;;  %v812_v19 = vld [vmem:[#allocation4 + $0x8] sm:$0xff] (!%p1064_p8) }
 0x149   : > { %v659_v20 = vpop.permute.xlu1 %658 }
 0x14a   : > { %v655_v46 = vpop.permute.xlu0 %654  ;;  %v679_v21 = vsub.f32 %v1813_v15, %v659_v20  ;;  %v696_v7 = vsel %vm694_vm9, %v688_v22, 0.0  ;;  %v695_v31 = vsel %vm694_vm9, %v686_v23, 0.0  ;;  %v813_v20 = vsel (!%p1064_p8), %vm522_vm4, %v811_v18, 0.0  ;;  %v797_v22 = vld [vmem:[#allocation3 + $0x8] sm:$0xff] (!%p1064_p8)  ;;  %v826_v23 = vld [vmem:[#allocation5] sm:$0xff] (!%p1064_p8) }
 0x14b   : > { %v677_v24 = vsub.f32 %v1825_v27, %v655_v46  ;;  %v474_v27 = vld [vmem:[%s1767_s24] sm:$0xff]  ;;  %v814_v46 = vsel (!%p1064_p8), %vm522_vm4, %v812_v19, 0.0 }
 0x14c   : > { %v689_v1 = vmul.f32 %v679_v21, %v679_v21  ;;  %v475_v40 = vsub.f32 %v473_v36, %v474_v27  ;;  %v796_v21 = vld [vmem:[#allocation3] sm:$0xff] (!%p1064_p8) }
 0x14d   : > { %v663_v25 = vpop.permute.xlu1 %662  ;;  %v687_v32 = vmul.f32 %v677_v24, %v677_v24  ;;  %v815_v24 = vadd.f32 (!%p1064_p8), %v814_v46, %v813_v20 }
 0x14e   : > { %v661_v28 = vpop.permute.xlu0 %660  ;;  %v681_v29 = vsub.f32 %v1835_v37, %v663_v25  ;;  %v703_v41 = vsel %vm694_vm9, %v689_v1, 0.0  ;;  %v477_v50 = vmul.f32 %v475_v40, %v475_v40  ;;  %v798_v25 = vsel (!%p1064_p8), %vm522_vm4, %v796_v21, 0.0 }
 0x14f   : > { %v680_v30 = vsub.f32 %v1843_v44, %v661_v28  ;;  %v697_v44 = vadd.f32 %v696_v7, %v695_v31  ;;  %v702_v43 = vsel %vm694_vm9, %v687_v32, 0.0  ;;  %v799_v28 = vsel (!%p1064_p8), %vm522_vm4, %v797_v22, 0.0 }
 0x150   : > { %v691_v38 = vmul.f32 %v681_v29, %v681_v29  ;;  %v478_v54 = vadd.f32 %v477_v50, %v476_v42  ;;  %v704_v14 = vadd.f32 %v703_v41, %v702_v43  ;;  %v827_v29 = vld [vmem:[#allocation5 + $0x8] sm:$0x7f] (!%p1064_p8)  ;;  %v800_v7 = vadd.f32 (!%p1064_p8), %v799_v28, %v798_v25 }
 0x151   : > { %v690_v15 = vmul.f32 %v680_v30, %v680_v30  ;;  %v667_v33 = vpop.permute.xlu1 %666  ;;  %v828_v30 = vsel (!%p1064_p8), %vm522_vm4, %v826_v23, 0.0  ;;  %v829_v31 = vsel (!%p1064_p8), %vm650_vm8, %v827_v29, 0.0 }
 0x152   : > { %v683_v34 = vsub.f32 %v1865_v61, %v667_v33  ;;  %v665_v35 = vpop.permute.xlu0 %664  ;;  %v705_v61 = vsel %vm694_vm9, %v691_v38, 0.0  ;;  %479 = vst [vmem:[#allocation2] sm:$0xff] %v478_v54  ;;  %v830_v33 = vadd.f32 (!%p1064_p8), %v829_v31, %v828_v30 }
 0x153   : > { %v698_v39 = vsel %vm694_vm9, %v690_v15, 0.0  ;;  %v682_v37 = vsub.f32 %v1871_v3, %v665_v35  ;;  %v706_v56 = vadd.f32 %v705_v61, %v704_v14 }
 0x154   : > { %v693_v47 = vmul.f32 %v683_v34, %v683_v34  ;;  %v699_v52 = vadd.f32 %v698_v39, %v697_v44 }
 0x155   : > { %v692_v48 = vmul.f32 %v682_v37, %v682_v37 }
 0x156   : > { %v707_v3 = vsel %vm694_vm9, %v693_v47, 0.0 }
 0x157   : > { %v700_v53 = vsel %vm694_vm9, %v692_v48, 0.0  ;;  %v708_v58 = vadd.f32 %v707_v3, %v706_v56 }
 0x158   : > { %v701_v55 = vadd.f32 %v700_v53, %v699_v52 }
 0x159   : > { %v785_v17 = vld [vmem:[#allocation2] sm:$0xff] (!%p1064_p8) }
 0x15a   : > { %711 = vrot.lane.b32.xlu1 %v701_v55, %s1425_s9  ;;  %786 = vadd.xlane.f32.xlu0 (!%p1064_p8), %v785_v17 }
 0x15e   : > { %713 = vrot.lane.b32.xlu1 %v708_v58, %s1425_s9  ;;  %801 = vadd.xlane.f32.xlu0 (!%p1064_p8), %v800_v7 }
 0x182   : > { %816 = vadd.xlane.f32.xlu1 (!%p1064_p8), %v815_v24 }
 0x186   : > { %831 = vadd.xlane.f32.xlu1 (!%p1064_p8), %v830_v33 }
 0x196   : > { %v763_v6 = vpop.xlane.xlu0 %762 }
 0x197   : > { %v766_v60 = vadd.f32 %v765_v59, %v763_v6 }
 0x199   : > { %v769_v49 = vand.u32 2147483647, %v766_v60  ;;  %v767_v0 = vsub.f32 0.0, %v766_v60 }
 0x19b   : > { %v770_v62 = vsub.f32 0.0, %v769_v49  ;;  %v768_v2 = vmax.f32 %v767_v0, 0.0 }
 0x19d   : > { %v771_v63 = vmul.f32 1.442695, %v770_v62 }
 0x19f   : > { %1169 = vpow2.f32 %v771_v63 }
 0x1a9   : > { %v1170_v57 = vpop.eup %1169 }
 0x1aa   : > { %v773_v26 = vadd.f32 1.0, %v1170_v57 }
 0x1ac   : > { %1171 = vlog2.f32 %v773_v26 }
 0x1b6   : > { %v1172_v45 = vpop.eup %1171 }
 0x1b7   : > { %v775_v4 = vmul.f32 0.6931472, %v1172_v45 }
 0x1b9   : > { %v776_v8 = vadd.f32 %v775_v4, %v768_v2 }
 0x1bb   : > { %v778_v51 = vadd.f32 %v777_v5, %v776_v8 }
 0x1bd   : > { %780 = vst.msk [vmem:[#allocation7] sm:$0x1] %vm779_vm10, %v778_v51 }
 0x1c4   : > { %v861_v8 = vld [vmem:[#allocation7] sm:$0x1] (!%p1064_p8) }
 0x1cc   : > { %v712_v10 = vpop.permute.xlu1 %711 }
 0x1cd   : > { %v717_v11 = vadd.f32 %v712_v10, %v684_v9  ;;  %784 = sbr.rel (%p1064_p8) target bundleno = 699 (0x2bb), region = 80 }
 0x1cf   : > { %720 = vst.msk [vmem:[#allocation6] sm:$0xff] %vm719_vm11, %v717_v11 }
 0x1d0   : > { %v714_v16 = vpop.permute.xlu1 %713 }
 0x1d1   : > { %v718_v13 = vadd.f32 %v714_v16, %v685_v12 }
 0x1d3   : > { %721 = vst.msk [vmem:[#allocation6 + $0x8] sm:$0xff] %vm719_vm11, %v718_v13 }
 0x1d6   : > { %v840_v1 = vld [vmem:[#allocation6] sm:$0xff] }
 0x1d7   : > { %v842_v15 = vsel %vm719_vm11, %v840_v1, 0.0 }
 0x1da   : > { %v841_v32 = vld [vmem:[#allocation6 + $0x8] sm:$0xff] }
 0x1db   : > { %v843_v34 = vsel %vm719_vm11, %v841_v32, 0.0 }
 0x1dc   : > { %v844_v35 = vadd.f32 %v843_v34, %v842_v15 }
 0x1de   : > { %845 = vadd.xlane.f32.xlu0 %v844_v35 }
 0x1e7   : > { %v787_v36 = vpop.xlane.xlu0 %786 }
 0x1e8   : > { %v788_v27 = vrot.slane %v787_v36, 4 }
 0x1ea   : > { %v789_v38 = vadd.f32 %v788_v27, %v787_v36 }
 0x1eb   : > { %v802_v40 = vpop.xlane.xlu0 %801 }
 0x1ec   : > { %v790_v44 = vrot.slane %v789_v38, 2  ;;  %v803_v41 = vrot.slane %v802_v40, 4 }
 0x1ee   : > { %v804_v43 = vadd.f32 %v803_v41, %v802_v40  ;;  %v791_v48 = vadd.f32 %v790_v44, %v789_v38 }
 0x1f0   : > { %v805_v53 = vrot.slane %v804_v43, 2  ;;  %v792_v14 = vrot.slane %v791_v48, 1 }
 0x1f2   : > { %v793_v58 = vadd.f32 %v792_v14, %v791_v48  ;;  %v806_v59 = vadd.f32 %v805_v53, %v804_v43 }
 0x1f4   : > { %1075 = vpush %v793_v58  ;;  %v807_v62 = vrot.slane %v806_v59, 1 }
 0x1f6   : > { %v808_v0 = vadd.f32 %v807_v62, %v806_v59 }
 0x1f8   : > { %1077 = vpush %v808_v0 }
 0x20f   : > { %v817_v39 = vpop.xlane.xlu1 %816 }
 0x210   : > { %v818_v37 = vrot.slane %v817_v39, 4 }
 0x212   : > { %v819_v42 = vadd.f32 %v818_v37, %v817_v39 }
 0x213   : > { %v832_v47 = vpop.xlane.xlu1 %831 }
 0x214   : > { %v820_v50 = vrot.slane %v819_v42, 2  ;;  %v833_v52 = vrot.slane %v832_v47, 4 }
 0x216   : > { %v834_v55 = vadd.f32 %v833_v52, %v832_v47  ;;  %v821_v3 = vadd.f32 %v820_v50, %v819_v42 }
 0x218   : > { %v835_v6 = vrot.slane %v834_v55, 2  ;;  %v822_v60 = vrot.slane %v821_v3, 1 }
 0x21a   : > { %v836_v63 = vadd.f32 %v835_v6, %v834_v55  ;;  %v823_v57 = vadd.f32 %v822_v60, %v821_v3 }
 0x21c   : > { %v837_v2 = vrot.slane %v836_v63, 1  ;;  %1079 = vpush %v823_v57 }
 0x21e   : > { %v838_v4 = vadd.f32 %v837_v2, %v836_v63 }
 0x220   : > { %1081 = vpush %v838_v4 }
 0x225   : > { %s1076_s11 = spop %1075 }
 0x226   : > { %s795_s17 = smul.f32 0.00048828125, %s1076_s11 }
 0x228   : > { %873 = sst [smem:[#allocation20]] %s795_s17 }
 0x229   : > { %s1078_s25 = spop %1077 }
 0x22a   : > { %s810_s3 = smul.f32 0.00048828125, %s1078_s25 }
 0x22c   : > { %875 = sst [smem:[#allocation20 + $0x1]] %s810_s3 }
 0x24d   : > { %s1080_s10 = spop %1079 }
 0x24e   : > { %s825_s14 = smul.f32 0.00048828125, %s1080_s10 }
 0x250   : > { %877 = sst [smem:[#allocation20 + $0x2]] %s825_s14  ;;  %s866_s19 = smul.f32 10.0, %s825_s14 }
 0x251   : > { %s1082_s20 = spop %1081 }
 0x252   : > { %s854_s21 = smul.f32 0.0010416667, %s1082_s20 }
 0x26b   : > { %v846_v61 = vpop.xlane.xlu0 %845 }
 0x26c   : > { %v847_v54 = vrot.slane %v846_v61, 4 }
 0x26e   : > { %v848_v56 = vadd.f32 %v847_v54, %v846_v61 }
 0x270   : > { %v849_v49 = vrot.slane %v848_v56, 2 }
 0x272   : > { %v850_v26 = vadd.f32 %v849_v49, %v848_v56 }
 0x274   : > { %v851_v45 = vrot.slane %v850_v26, 1 }
 0x276   : > { %v852_v5 = vadd.f32 %v851_v45, %v850_v26 }
 0x278   : > { %1083 = vpush %v852_v5 }
 0x279   : > { %1085 = vpush %v861_v8 }
 0x2a9   : > { %s1084_s29 = spop %1083 }
 0x2aa   : > { %s855_s26 = smul.f32 0.0010416667, %s1084_s29  ;;  %s1086_s23 = spop %1085 }
 0x2ab   : > { %s864_s28 = smul.f32 0.5, %s1086_s23 }
 0x2ac   : > { %s856_s1 = sadd.f32 %s855_s26, %s854_s21 }
 0x2ad   : > { %s865_s22 = smul.f32 10.0, %s864_s28  ;;  %881 = sst [smem:[#allocation20 + $0x4]] %s864_s28 }
 0x2ae   : > { %s857_s13 = smul.f32 2.0, %s856_s1 }
 0x2af   : > { %s867_s15 = sadd.f32 %s866_s19, %s865_s22 }
 0x2b0   : > { %s860_s24 = smul.f32 0.5, %s857_s13 }
 0x2b2   : > { %s868_s7 = smul.f32 5.0, %s860_s24  ;;  %879 = sst [smem:[#allocation20 + $0x3]] %s860_s24 }
 0x2b4   : > { %s869_s6 = sadd.f32 %s868_s7, %s867_s15 }
 0x2b6   : > { %s870_s16 = sadd.f32 %s869_s6, %s810_s3 }
 0x2b8   : > { %s871_s18 = sadd.f32 %s870_s16, %s795_s17 }
 0x2ba   : > { %883 = sst [smem:[#allocation20 + $0x5]] %s871_s18 }
 0x2bb PF: > { %p1128_p10 = scmp.eq.s32.totalorder %s1601_s30, 1  ;;  %s2040_s12 = sld [smem:[#allocation31_spill]] }
 0x2c1   : > { %s1351_s11 = scalar_lea.hbm %s2040_s12, 16 }
 0x2c2   : > { %p1352_p12 = scmp.ne.s32.totalorder %s2040_s12, %s1351_s11  ;;  %p1357_p0 = scmp.lt.u32.totalorder %s1351_s11, %s2040_s12 }
 0x2c4   : > { %p1353_p1 = pnand %p1352_p12, %p1128_p10 }
 0x2c6   : > { %p1354_p13 = pneg %p1353_p1 }
 0x2c8   : > { %p1359_p9 = pnand %p1357_p0, %p1354_p13 }
 0x2ca   : > { %1362 = shalt.err (!%p1359_p9)
}
 0x2cb   : > { %s1426_s17 = smov [#allocation20]  }
 0x2cc   : > { %1102 = dma.smem_to_hbm (%p1128_p10), %s1426_s17, 16, %s2040_s12, [#allocation11]  }
 0x2cd   : > { %1396 = dma.done.wait (%p1128_p10), [#allocation11], 16  }
 0x2ce   : > { %1398 = vsyncadd (%p1128_p10), [#allocation11], 4294967280 }
 0x2cf   : > { %897 = sfence }
 0x2d0 PF: > { %s2041_s29 = sld [smem:[#allocation27_spill]]  ;;  %s2042_s30 = sld [smem:[#allocation26_spill]] }
 0x2d1   : > { %s2043_s28 = sld [smem:[#allocation28_spill]]  ;;  %s2044_s26 = smov %s1405_s27 }
 0x2d6   : > { %p26_p4 = scmp.ge.s32.totalorder %s2041_s29, 4   ;;  %s2045_s27 = smov %s2042_s30 }
 0x2d8   :  { %28 = sbr.rel (!%p26_p4) target bundleno = 14 (0xe), region = 151 }
 0x2df   :  { %903 = vsyncpa [#allocation10], 1 }
 0x2e0   :  { %905 = vsyncpa [#allocation10 + $0x1], 1 }
 0x2e1   :  { %906 = vsyncpa [#allocation13], 1 }
 0x2e2   :  { %908 = vsyncpa [#allocation13 + $0x1], 1 }
 0x2e3   :  { %909 = vsyncpa [#allocation16], 1 }
 0x2e4   :  { %911 = vsyncpa [#allocation16 + $0x1], 1 }
 0x2e5   :  { %912 = vsyncpa [#allocation19], 1 }
 0x2e6   :  { %913 = vsyncpa [#allocation11], 1 }
 0x2e7   :  { %915 = vsyncpa [#allocation11 + $0x1], 1 }

</bundles_post_ra>
